<compile_context>
chip_gen: v5e
topology: v5e:2x2
jax: 0.10.0
libtpu: 0.0.40
codegen_flags: <defaults>
</compile_context>

<pallas_src>
import functools
import math

import jax
import jax.numpy as jnp
from jax import lax
from jax.experimental import pallas as pl
from jax.experimental.pallas import tpu as pltpu

_VMEM = pl.BlockSpec(memory_space=pltpu.MemorySpace.VMEM)
_MASK_VAL = -1e30  # additive mask value (safe in f32, no -inf/NaN risk)


def _gelu_tanh(x):
    # GPT-2 "gelu_new" / tanh-approximate GELU.
    return 0.5 * x * (1.0 + jnp.tanh(
        jnp.sqrt(2.0 / jnp.pi).astype(x.dtype) * (x + 0.044715 * x * x * x)))


def _layernorm(x, g, b, eps=1e-5):
    mu = jnp.mean(x, axis=-1, keepdims=True)
    var = jnp.mean(jnp.square(x - mu), axis=-1, keepdims=True)
    return (x - mu) * lax.rsqrt(var + eps) * g + b


# ----------------------------- embedding kernel -----------------------------
def _embed_kernel(clip_ref, cw_ref, cb_ref, tok_ref, wte_ref, wpe_ref, o_ref,
                  *, batch, prefix_len, seq_len):
    p, s = prefix_len, seq_len
    t = p + s
    vocab_pad = wte_ref.shape[0]

    # clip_project: MLP((prefix_size, D)) == single Linear, no activation.
    emb_clip = (jnp.dot(clip_ref[...], cw_ref[...],
                        preferred_element_type=jnp.float32) + cb_ref[...])   # (B, D)

    # wte gather as one-hot @ wte (MXU-friendly, no in-kernel dynamic gather).
    tok = tok_ref[...]                                                       # (B*S, 1) int32
    iota = lax.broadcasted_iota(jnp.int32, (tok.shape[0], vocab_pad), 1)
    onehot = (iota == tok).astype(jnp.float32)
    emb_text = jnp.dot(onehot, wte_ref[...],
                       preferred_element_type=jnp.float32)                   # (B*S, D)

    pe = wpe_ref[...]                                                        # (n_pos, D)
    for b in range(batch):                                                   # B is tiny & static
        o_ref[b * t:b * t + p, :] = (
            emb_clip[b * p:(b + 1) * p, :] + pe[0:p, :]).astype(o_ref.dtype)
        o_ref[b * t + p:(b + 1) * t, :] = (
            emb_text[b * s:(b + 1) * s, :] + pe[p:t, :]).astype(o_ref.dtype)


# -------------------------- fused transformer block --------------------------
def _block_kernel(h_ref, bias_ref,
                  ln1_g_ref, ln1_b_ref, c_attn_w_ref, c_attn_b_ref,
                  attn_cproj_w_ref, attn_cproj_b_ref,
                  attn_ad_w1_ref, attn_ad_b1_ref, attn_ad_w2_ref, attn_ad_b2_ref,
                  ln2_g_ref, ln2_b_ref, c_fc_w_ref, c_fc_b_ref,
                  mlp_cproj_w_ref, mlp_cproj_b_ref,
                  mlp_ad_w1_ref, mlp_ad_b1_ref, mlp_ad_w2_ref, mlp_ad_b2_ref,
                  o_ref, *, n_head):
    x = h_ref[...].astype(jnp.float32)                    # (B*T, D), resident in VMEM
    bt, d = x.shape
    dh = d // n_head
    scale = 1.0 / math.sqrt(dh)
    bias = bias_ref[...]                                  # (B*T, B*T) causal + per-example mask

    # ---- attention sub-block: ln1 -> c_attn -> SDPA -> c_proj + Adapter -> residual
    a = _layernorm(x, ln1_g_ref[...], ln1_b_ref[...])
    attn_y = jnp.zeros((bt, d), jnp.float32)
    for hh in range(n_head):                              # heads = contiguous lane chunks
        qo, ko, vo = hh * dh, d + hh * dh, 2 * d + hh * dh
        qh = (jnp.dot(a, c_attn_w_ref[:, qo:qo + dh], preferred_element_type=jnp.float32)
              + c_attn_b_ref[:, qo:qo + dh])
        kh = (jnp.dot(a, c_attn_w_ref[:, ko:ko + dh], preferred_element_type=jnp.float32)
              + c_attn_b_ref[:, ko:ko + dh])
        vh = (jnp.dot(a, c_attn_w_ref[:, vo:vo + dh], preferred_element_type=jnp.float32)
              + c_attn_b_ref[:, vo:vo + dh])
        s = lax.dot_general(qh, kh, (((1,), (1,)), ((), ())),
                            preferred_element_type=jnp.float32) * scale + bias
        m = jnp.max(s, axis=-1, keepdims=True)
        e = jnp.exp(s - m)
        prob = e * pl.reciprocal(jnp.sum(e, axis=-1, keepdims=True), approx=True)
        oh = jnp.dot(prob, vh, preferred_element_type=jnp.float32)        # (B*T, dh)
        # merged heads folded straight into c_proj:
        #   concat_h(oh) @ Wp == sum_h oh @ Wp[h*dh:(h+1)*dh, :]
        attn_y = attn_y + jnp.dot(oh, attn_cproj_w_ref[hh * dh:(hh + 1) * dh, :],
                                  preferred_element_type=jnp.float32)
    attn_y = attn_y + attn_cproj_b_ref[...]

    # Adapter on attn.c_proj (skip_connect=True; dropout/DropPath identity in eval).
    # TODO(synk): nn.GELU defaults to exact erf-GELU; tanh approximation is used here
    # (output identical in this module because D_fc2 weight/bias are zero-initialized).
    ad = (jnp.dot(_gelu_tanh(jnp.dot(attn_y, attn_ad_w1_ref[...],
                                     preferred_element_type=jnp.float32)
                             + attn_ad_b1_ref[...]),
                  attn_ad_w2_ref[...], preferred_element_type=jnp.float32)
          + attn_ad_w2_ref.shape[0] * 0.0 + attn_ad_b2_ref[...])
    h1 = x + attn_y + ad                                  # residual fused in-kernel

    # ---- MLP sub-block: ln2 -> c_fc (gelu_new) -> c_proj + Adapter -> residual
    mfeat = _layernorm(h1, ln2_g_ref[...], ln2_b_ref[...])
    mfeat = _gelu_tanh(jnp.dot(mfeat, c_fc_w_ref[...],
                               preferred_element_type=jnp.float32) + c_fc_b_ref[...])
    mlp_y = (jnp.dot(mfeat, mlp_cproj_w_ref[...], preferred_element_type=jnp.float32)
             + mlp_cproj_b_ref[...])
    ad2 = (jnp.dot(_gelu_tanh(jnp.dot(mlp_y, mlp_ad_w1_ref[...],
                                      preferred_element_type=jnp.float32)
                              + mlp_ad_b1_ref[...]),
                   mlp_ad_w2_ref[...], preferred_element_type=jnp.float32)
           + mlp_ad_b2_ref[...])
    o_ref[...] = (h1 + mlp_y + ad2).astype(o_ref.dtype)


# --------------------------- final ln_f + lm_head ----------------------------
def _final_kernel(h_ref, g_ref, b_ref, wte_ref, o_ref):
    x = _layernorm(h_ref[...].astype(jnp.float32), g_ref[...], b_ref[...])
    # lm_head: weights tied to wte, no bias; contract on the embedding axis so no
    # wrapper-side transpose of the weight is materialized.
    o_ref[...] = lax.dot_general(x, wte_ref[...], (((1,), (1,)), ((), ())),
                                 preferred_element_type=jnp.float32).astype(o_ref.dtype)


# ------------------------------ model definition -----------------------------
class Config:
    prefix_size = 48
    prefix_len = 1
    n_embd = 32          # embedding_size
    n_head = 4
    n_layer = 2          # small stand-in for GPT-2's 12 blocks
    n_inner = 128        # 4 * n_embd
    vocab_size = 64
    n_positions = 32
    adapter_ratio = 0.5  # Adapter mlp_ratio


def init_params(key, cfg):
    d = cfg.n_embd
    da = int(d * cfg.adapter_ratio)
    vocab_pad = ((cfg.vocab_size + 127) // 128) * 128     # lane-dense logits
    keys = iter(jax.random.split(key, 8 + cfg.n_layer * 16))

    def nrm(shape, scale=0.02):
        return scale * jax.random.normal(next(keys), shape, jnp.float32)

    wte = nrm((cfg.vocab_size, d))
    wte = jnp.pad(wte, ((0, vocab_pad - cfg.vocab_size), (0, 0)))  # padded rows unused

    params = {
        "clip_w": nrm((cfg.prefix_size, d)),   # clip_project: MLP((prefix_size, D)) == one Linear
        "clip_b": nrm((d,)),
        "wte": wte,                            # (vocab_pad, D)
        "wpe": nrm((cfg.n_positions, d)),
        "ln_f_g": jnp.ones((d,), jnp.float32),
        "ln_f_b": jnp.zeros((d,), jnp.float32),
        "blocks": [],
    }
    for _ in range(cfg.n_layer):
        blk = {
            "ln1_g": jnp.ones((d,), jnp.float32),
            "ln1_b": jnp.zeros((d,), jnp.float32),
            "c_attn_w": nrm((d, 3 * d)),
            "c_attn_b": nrm((3 * d,)),
            "attn_cproj_w": nrm((d, d)),
            "attn_cproj_b": nrm((d,)),
            # Adapter on attn.c_proj — D_fc2 zero-initialized (init_parameters)
            "attn_ad_w1": nrm((d, da)),
            "attn_ad_b1": nrm((da,)),
            "attn_ad_w2": jnp.zeros((da, d), jnp.float32),
            "attn_ad_b2": jnp.zeros((d,), jnp.float32),
            "ln2_g": jnp.ones((d,), jnp.float32),
            "ln2_b": jnp.zeros((d,), jnp.float32),
            "c_fc_w": nrm((d, cfg.n_inner)),
            "c_fc_b": nrm((cfg.n_inner,)),
            "mlp_cproj_w": nrm((cfg.n_inner, d)),
            "mlp_cproj_b": nrm((d,)),
            # Adapter on mlp.c_proj — D_fc2 zero-initialized
            "mlp_ad_w1": nrm((d, da)),
            "mlp_ad_b1": nrm((da,)),
            "mlp_ad_w2": jnp.zeros((da, d), jnp.float32),
            "mlp_ad_b2": jnp.zeros((d,), jnp.float32),
        }
        params["blocks"].append(blk)
    return params


def make_forward(cfg, mask=None, labels=None):
    # TODO(synk): attention_mask / labels (LM loss) code paths not implemented;
    # the reference forward is exercised with mask=None, labels=None.
    assert mask is None and labels is None

    @jax.jit
    def forward(params, clip_features, gpt_tokens):
        b = clip_features.shape[0]
        seq = gpt_tokens.shape[1]
        d = cfg.n_embd
        t = cfg.prefix_len + seq
        bt = b * t
        vocab_pad = params["wte"].shape[0]

        tokens_col = gpt_tokens.reshape(b * seq, 1).astype(jnp.int32)

        # Additive causal + block-diagonal (per-example) attention bias of shape
        # (B*T, B*T), shared by every layer/head: keeps attention a single matmul
        # over the flat (B*T, dh) slabs — no head/batch reshapes in-kernel.
        qi = jnp.arange(bt)[:, None]
        ki = jnp.arange(bt)[None, :]
        allowed = ((qi // t) == (ki // t)) & ((ki % t) <= (qi % t))
        attn_bias = jnp.where(allowed, 0.0, _MASK_VAL).astype(jnp.float32)

        # --- fused embedding: clip_project + wte gather + concat + wpe add ---
        h = pl.pallas_call(
            functools.partial(_embed_kernel, batch=b,
                              prefix_len=cfg.prefix_len, seq_len=seq),
            out_shape=jax.ShapeDtypeStruct((bt, d), jnp.float32),
            in_specs=[_VMEM] * 6,
            out_specs=_VMEM,
        )(clip_features, params["clip_w"], params["clip_b"].reshape(1, d),
          tokens_col, params["wte"], params["wpe"])

        # --- one fused kernel per transformer block ---
        block_call = pl.pallas_call(
            functools.partial(_block_kernel, n_head=cfg.n_head),
            out_shape=jax.ShapeDtypeStruct((bt, d), jnp.float32),
            in_specs=[_VMEM] * 22,
            out_specs=_VMEM,
        )
        for blk in params["blocks"]:
            h = block_call(
                h, attn_bias,
                blk["ln1_g"].reshape(1, d), blk["ln1_b"].reshape(1, d),
                blk["c_attn_w"], blk["c_attn_b"].reshape(1, 3 * d),
                blk["attn_cproj_w"], blk["attn_cproj_b"].reshape(1, d),
                blk["attn_ad_w1"], blk["attn_ad_b1"].reshape(1, -1),
                blk["attn_ad_w2"], blk["attn_ad_b2"].reshape(1, d),
                blk["ln2_g"].reshape(1, d), blk["ln2_b"].reshape(1, d),
                blk["c_fc_w"], blk["c_fc_b"].reshape(1, -1),
                blk["mlp_cproj_w"], blk["mlp_cproj_b"].reshape(1, d),
                blk["mlp_ad_w1"], blk["mlp_ad_b1"].reshape(1, -1),
                blk["mlp_ad_w2"], blk["mlp_ad_b2"].reshape(1, d),
            )

        # --- fused ln_f + tied lm_head (lane-dense padded-vocab output) ---
        logits_pad = pl.pallas_call(
            _final_kernel,
            out_shape=jax.ShapeDtypeStruct((bt, vocab_pad), jnp.float32),
            in_specs=[_VMEM] * 4,
            out_specs=_VMEM,
        )(h, params["ln_f_g"].reshape(1, d), params["ln_f_b"].reshape(1, d),
          params["wte"])

        return logits_pad.reshape(b, t, vocab_pad)[:, :, :cfg.vocab_size]

    return forward


if __name__ == "__main__":
    cfg = Config()
    key = jax.random.PRNGKey(0)
    pkey, fkey, tkey = jax.random.split(key, 3)
    params = init_params(pkey, cfg)

    B, seq = 2, 8
    clip_features = jax.random.normal(fkey, (B, cfg.prefix_size), jnp.float32)
    gpt_tokens = jax.random.randint(tkey, (B, seq), 0, cfg.vocab_size)

    forward = make_forward(cfg)
    logits = forward(params, clip_features, gpt_tokens)
    jax.block_until_ready(logits)
    assert logits.shape == (B, cfg.prefix_len + seq, cfg.vocab_size)
    assert logits.dtype == jnp.float32
    assert bool(jnp.all(jnp.isfinite(logits)))
    print("KERNEL_OK")
</pallas_src>

<mosaic_0001>
module attributes {stable_mosaic.version = 11 : i64} {
  func.func @_embed_kernel(%arg0: memref<2x48xf32, #tpu.memory_space<vmem>>, %arg1: memref<48x32xf32, #tpu.memory_space<vmem>>, %arg2: memref<1x32xf32, #tpu.memory_space<vmem>>, %arg3: memref<16x1xi32, #tpu.memory_space<vmem>>, %arg4: memref<128x32xf32, #tpu.memory_space<vmem>>, %arg5: memref<32x32xf32, #tpu.memory_space<vmem>>, %arg6: memref<18x32xf32, #tpu.memory_space<vmem>>) attributes {dimension_semantics = [], scalar_prefetch = 0 : i64, scratch_operands = 0 : i64, tpu.core_type = #tpu.core_type<tc>} {
    %c0 = arith.constant 0 : index
    %c0_0 = arith.constant 0 : index
    %0 = vector.load %arg0[%c0, %c0_0] : memref<2x48xf32, #tpu.memory_space<vmem>>, vector<2x48xf32>
    %c0_1 = arith.constant 0 : index
    %c0_2 = arith.constant 0 : index
    %1 = vector.load %arg1[%c0_1, %c0_2] : memref<48x32xf32, #tpu.memory_space<vmem>>, vector<48x32xf32>
    %cst = arith.constant dense<0.000000e+00> : vector<2x32xf32>
    %2 = tpu.matmul %0, %1, %cst {dimension_numbers = #tpu.dot_dimension_numbers<[1], [0], [0], [1], [0, 0, 1, 1], [], []>} : vector<2x48xf32>, vector<48x32xf32>, vector<2x32xf32> -> vector<2x32xf32>
    %c0_3 = arith.constant 0 : index
    %c0_4 = arith.constant 0 : index
    %3 = vector.load %arg2[%c0_3, %c0_4] : memref<1x32xf32, #tpu.memory_space<vmem>>, vector<1x32xf32>
    %4 = vector.broadcast %3 : vector<1x32xf32> to vector<2x32xf32>
    %5 = arith.addf %2, %4 : vector<2x32xf32>
    %c0_5 = arith.constant 0 : index
    %c0_6 = arith.constant 0 : index
    %6 = vector.load %arg3[%c0_5, %c0_6] : memref<16x1xi32, #tpu.memory_space<vmem>>, vector<16x1xi32>
    %7 = tpu.iota {dimensions = array<i32: 1>} : vector<16x128xi32>
    %8 = vector.broadcast %6 : vector<16x1xi32> to vector<16x128xi32>
    %9 = arith.cmpi eq, %7, %8 : vector<16x128xi32>
    %10 = arith.extui %9 : vector<16x128xi1> to vector<16x128xi32>
    %11 = arith.sitofp %10 : vector<16x128xi32> to vector<16x128xf32>
    %c0_7 = arith.constant 0 : index
    %c0_8 = arith.constant 0 : index
    %12 = vector.load %arg4[%c0_7, %c0_8] : memref<128x32xf32, #tpu.memory_space<vmem>>, vector<128x32xf32>
    %cst_9 = arith.constant dense<0.000000e+00> : vector<16x32xf32>
    %13 = tpu.matmul %11, %12, %cst_9 {dimension_numbers = #tpu.dot_dimension_numbers<[1], [0], [0], [1], [0, 0, 1, 1], [], []>} : vector<16x128xf32>, vector<128x32xf32>, vector<16x32xf32> -> vector<16x32xf32>
    %c0_10 = arith.constant 0 : index
    %c0_11 = arith.constant 0 : index
    %14 = vector.load %arg5[%c0_10, %c0_11] : memref<32x32xf32, #tpu.memory_space<vmem>>, vector<32x32xf32>
    %15 = vector.extract_strided_slice %5 {offsets = [0, 0], sizes = [1, 32], strides = [1, 1]} : vector<2x32xf32> to vector<1x32xf32>
    %16 = vector.extract_strided_slice %14 {offsets = [0, 0], sizes = [1, 32], strides = [1, 1]} : vector<32x32xf32> to vector<1x32xf32>
    %17 = arith.addf %15, %16 : vector<1x32xf32>
    %c0_12 = arith.constant 0 : index
    %c0_13 = arith.constant 0 : index
    %18 = vector.load %arg6[%c0_12, %c0_13] : memref<18x32xf32, #tpu.memory_space<vmem>>, vector<1x32xf32>
    tpu.vector_store %arg6[%c0_12, %c0_13], %17 {strides = array<i32>} : memref<18x32xf32, #tpu.memory_space<vmem>>, vector<1x32xf32>,
    %19 = vector.extract_strided_slice %13 {offsets = [0, 0], sizes = [8, 32], strides = [1, 1]} : vector<16x32xf32> to vector<8x32xf32>
    %20 = vector.extract_strided_slice %14 {offsets = [1, 0], sizes = [8, 32], strides = [1, 1]} : vector<32x32xf32> to vector<8x32xf32>
    %21 = arith.addf %19, %20 : vector<8x32xf32>
    %c1 = arith.constant 1 : index
    %c0_14 = arith.constant 0 : index
    %22 = vector.load %arg6[%c1, %c0_14] : memref<18x32xf32, #tpu.memory_space<vmem>>, vector<8x32xf32>
    tpu.vector_store %arg6[%c1, %c0_14], %21 {strides = array<i32>} : memref<18x32xf32, #tpu.memory_space<vmem>>, vector<8x32xf32>,
    %23 = vector.extract_strided_slice %5 {offsets = [1, 0], sizes = [1, 32], strides = [1, 1]} : vector<2x32xf32> to vector<1x32xf32>
    %24 = vector.extract_strided_slice %14 {offsets = [0, 0], sizes = [1, 32], strides = [1, 1]} : vector<32x32xf32> to vector<1x32xf32>
    %25 = arith.addf %23, %24 : vector<1x32xf32>
    %c9 = arith.constant 9 : index
    %c0_15 = arith.constant 0 : index
    %26 = vector.load %arg6[%c9, %c0_15] : memref<18x32xf32, #tpu.memory_space<vmem>>, vector<1x32xf32>
    tpu.vector_store %arg6[%c9, %c0_15], %25 {strides = array<i32>} : memref<18x32xf32, #tpu.memory_space<vmem>>, vector<1x32xf32>,
    %27 = vector.extract_strided_slice %13 {offsets = [8, 0], sizes = [8, 32], strides = [1, 1]} : vector<16x32xf32> to vector<8x32xf32>
    %28 = vector.extract_strided_slice %14 {offsets = [1, 0], sizes = [8, 32], strides = [1, 1]} : vector<32x32xf32> to vector<8x32xf32>
    %29 = arith.addf %27, %28 : vector<8x32xf32>
    %c10 = arith.constant 10 : index
    %c0_16 = arith.constant 0 : index
    %30 = vector.load %arg6[%c10, %c0_16] : memref<18x32xf32, #tpu.memory_space<vmem>>, vector<8x32xf32>
    tpu.vector_store %arg6[%c10, %c0_16], %29 {strides = array<i32>} : memref<18x32xf32, #tpu.memory_space<vmem>>, vector<8x32xf32>,
    return
  }
}

module attributes {stable_mosaic.version = 11 : i64} {
  func.func @_final_kernel(%arg0: memref<18x32xf32, #tpu.memory_space<vmem>>, %arg1: memref<1x32xf32, #tpu.memory_space<vmem>>, %arg2: memref<1x32xf32, #tpu.memory_space<vmem>>, %arg3: memref<128x32xf32, #tpu.memory_space<vmem>>, %arg4: memref<18x128xf32, #tpu.memory_space<vmem>>) attributes {dimension_semantics = [], scalar_prefetch = 0 : i64, scratch_operands = 0 : i64, tpu.core_type = #tpu.core_type<tc>} {
    %c0 = arith.constant 0 : index
    %c0_0 = arith.constant 0 : index
    %0 = vector.load %arg0[%c0, %c0_0] : memref<18x32xf32, #tpu.memory_space<vmem>>, vector<18x32xf32>
    %c0_1 = arith.constant 0 : index
    %c0_2 = arith.constant 0 : index
    %1 = vector.load %arg1[%c0_1, %c0_2] : memref<1x32xf32, #tpu.memory_space<vmem>>, vector<1x32xf32>
    %c0_3 = arith.constant 0 : index
    %c0_4 = arith.constant 0 : index
    %2 = vector.load %arg2[%c0_3, %c0_4] : memref<1x32xf32, #tpu.memory_space<vmem>>, vector<1x32xf32>
    %cst = arith.constant dense<0.000000e+00> : vector<18xf32>
    %3 = vector.multi_reduction <add>, %0, %cst [1] : vector<18x32xf32> to vector<18xf32>
    %4 = vector.shape_cast %3 : vector<18xf32> to vector<18x1xf32>
    %cst_5 = arith.constant 3.200000e+01 : f32
    %5 = vector.broadcast %cst_5 : f32 to vector<18x1xf32>
    %6 = arith.divf %4, %5 : vector<18x1xf32>
    %7 = vector.broadcast %6 : vector<18x1xf32> to vector<18x32xf32>
    %8 = arith.subf %0, %7 : vector<18x32xf32>
    %9 = arith.mulf %8, %8 : vector<18x32xf32>
    %cst_6 = arith.constant dense<0.000000e+00> : vector<18xf32>
    %10 = vector.multi_reduction <add>, %9, %cst_6 [1] : vector<18x32xf32> to vector<18xf32>
    %11 = vector.shape_cast %10 : vector<18xf32> to vector<18x1xf32>
    %cst_7 = arith.constant 3.200000e+01 : f32
    %12 = vector.broadcast %cst_7 : f32 to vector<18x1xf32>
    %13 = arith.divf %11, %12 : vector<18x1xf32>
    %14 = vector.broadcast %6 : vector<18x1xf32> to vector<18x32xf32>
    %15 = arith.subf %0, %14 : vector<18x32xf32>
    %cst_8 = arith.constant 9.99999974E-6 : f32
    %16 = vector.broadcast %cst_8 : f32 to vector<18x1xf32>
    %17 = arith.addf %13, %16 : vector<18x1xf32>
    %18 = math.rsqrt %17 : vector<18x1xf32>
    %19 = vector.broadcast %18 : vector<18x1xf32> to vector<18x32xf32>
    %20 = arith.mulf %15, %19 : vector<18x32xf32>
    %21 = vector.broadcast %1 : vector<1x32xf32> to vector<18x32xf32>
    %22 = arith.mulf %20, %21 : vector<18x32xf32>
    %23 = vector.broadcast %2 : vector<1x32xf32> to vector<18x32xf32>
    %24 = arith.addf %22, %23 : vector<18x32xf32>
    %c0_9 = arith.constant 0 : index
    %c0_10 = arith.constant 0 : index
    %25 = vector.load %arg3[%c0_9, %c0_10] : memref<128x32xf32, #tpu.memory_space<vmem>>, vector<128x32xf32>
    %cst_11 = arith.constant dense<0.000000e+00> : vector<18x128xf32>
    %26 = tpu.matmul %24, %25, %cst_11 {dimension_numbers = #tpu.dot_dimension_numbers<[1], [1], [0], [0], [0, 0, 1, 0], [], []>} : vector<18x32xf32>, vector<128x32xf32>, vector<18x128xf32> -> vector<18x128xf32>
    %c0_12 = arith.constant 0 : index
    %c0_13 = arith.constant 0 : index
    %27 = vector.load %arg4[%c0_12, %c0_13] : memref<18x128xf32, #tpu.memory_space<vmem>>, vector<18x128xf32>
    tpu.vector_store %arg4[%c0_12, %c0_13], %26 {strides = array<i32>} : memref<18x128xf32, #tpu.memory_space<vmem>>, vector<18x128xf32>,
    return
  }
}

module attributes {stable_mosaic.version = 11 : i64} {
  func.func @_block_kernel(%arg0: memref<18x32xf32, #tpu.memory_space<vmem>>, %arg1: memref<18x18xf32, #tpu.memory_space<vmem>>, %arg2: memref<1x32xf32, #tpu.memory_space<vmem>>, %arg3: memref<1x32xf32, #tpu.memory_space<vmem>>, %arg4: memref<32x96xf32, #tpu.memory_space<vmem>>, %arg5: memref<1x96xf32, #tpu.memory_space<vmem>>, %arg6: memref<32x32xf32, #tpu.memory_space<vmem>>, %arg7: memref<1x32xf32, #tpu.memory_space<vmem>>, %arg8: memref<32x16xf32, #tpu.memory_space<vmem>>, %arg9: memref<1x16xf32, #tpu.memory_space<vmem>>, %arg10: memref<16x32xf32, #tpu.memory_space<vmem>>, %arg11: memref<1x32xf32, #tpu.memory_space<vmem>>, %arg12: memref<1x32xf32, #tpu.memory_space<vmem>>, %arg13: memref<1x32xf32, #tpu.memory_space<vmem>>, %arg14: memref<32x128xf32, #tpu.memory_space<vmem>>, %arg15: memref<1x128xf32, #tpu.memory_space<vmem>>, %arg16: memref<128x32xf32, #tpu.memory_space<vmem>>, %arg17: memref<1x32xf32, #tpu.memory_space<vmem>>, %arg18: memref<32x16xf32, #tpu.memory_space<vmem>>, %arg19: memref<1x16xf32, #tpu.memory_space<vmem>>, %arg20: memref<16x32xf32, #tpu.memory_space<vmem>>, %arg21: memref<1x32xf32, #tpu.memory_space<vmem>>, %arg22: memref<18x32xf32, #tpu.memory_space<vmem>>) attributes {dimension_semantics = [], scalar_prefetch = 0 : i64, scratch_operands = 0 : i64, tpu.core_type = #tpu.core_type<tc>} {
    %c0 = arith.constant 0 : index
    %c0_0 = arith.constant 0 : index
    %0 = vector.load %arg0[%c0, %c0_0] : memref<18x32xf32, #tpu.memory_space<vmem>>, vector<18x32xf32>
    %c0_1 = arith.constant 0 : index
    %c0_2 = arith.constant 0 : index
    %1 = vector.load %arg1[%c0_1, %c0_2] : memref<18x18xf32, #tpu.memory_space<vmem>>, vector<18x18xf32>
    %c0_3 = arith.constant 0 : index
    %c0_4 = arith.constant 0 : index
    %2 = vector.load %arg2[%c0_3, %c0_4] : memref<1x32xf32, #tpu.memory_space<vmem>>, vector<1x32xf32>
    %c0_5 = arith.constant 0 : index
    %c0_6 = arith.constant 0 : index
    %3 = vector.load %arg3[%c0_5, %c0_6] : memref<1x32xf32, #tpu.memory_space<vmem>>, vector<1x32xf32>
    %cst = arith.constant dense<0.000000e+00> : vector<18xf32>
    %4 = vector.multi_reduction <add>, %0, %cst [1] : vector<18x32xf32> to vector<18xf32>
    %5 = vector.shape_cast %4 : vector<18xf32> to vector<18x1xf32>
    %cst_7 = arith.constant 3.200000e+01 : f32
    %6 = vector.broadcast %cst_7 : f32 to vector<18x1xf32>
    %7 = arith.divf %5, %6 : vector<18x1xf32>
    %8 = vector.broadcast %7 : vector<18x1xf32> to vector<18x32xf32>
    %9 = arith.subf %0, %8 : vector<18x32xf32>
    %10 = arith.mulf %9, %9 : vector<18x32xf32>
    %cst_8 = arith.constant dense<0.000000e+00> : vector<18xf32>
    %11 = vector.multi_reduction <add>, %10, %cst_8 [1] : vector<18x32xf32> to vector<18xf32>
    %12 = vector.shape_cast %11 : vector<18xf32> to vector<18x1xf32>
    %cst_9 = arith.constant 3.200000e+01 : f32
    %13 = vector.broadcast %cst_9 : f32 to vector<18x1xf32>
    %14 = arith.divf %12, %13 : vector<18x1xf32>
    %15 = vector.broadcast %7 : vector<18x1xf32> to vector<18x32xf32>
    %16 = arith.subf %0, %15 : vector<18x32xf32>
    %cst_10 = arith.constant 9.99999974E-6 : f32
    %17 = vector.broadcast %cst_10 : f32 to vector<18x1xf32>
    %18 = arith.addf %14, %17 : vector<18x1xf32>
    %19 = math.rsqrt %18 : vector<18x1xf32>
    %20 = vector.broadcast %19 : vector<18x1xf32> to vector<18x32xf32>
    %21 = arith.mulf %16, %20 : vector<18x32xf32>
    %22 = vector.broadcast %2 : vector<1x32xf32> to vector<18x32xf32>
    %23 = arith.mulf %21, %22 : vector<18x32xf32>
    %24 = vector.broadcast %3 : vector<1x32xf32> to vector<18x32xf32>
    %25 = arith.addf %23, %24 : vector<18x32xf32>
    %cst_11 = arith.constant 0.000000e+00 : f32
    %26 = vector.broadcast %cst_11 : f32 to vector<18x32xf32>
    %c0_12 = arith.constant 0 : index
    %c0_13 = arith.constant 0 : index
    %27 = vector.load %arg4[%c0_12, %c0_13] : memref<32x96xf32, #tpu.memory_space<vmem>>, vector<32x8xf32>
    %cst_14 = arith.constant dense<0.000000e+00> : vector<18x8xf32>
    %28 = tpu.matmul %25, %27, %cst_14 {dimension_numbers = #tpu.dot_dimension_numbers<[1], [0], [0], [1], [0, 0, 1, 1], [], []>} : vector<18x32xf32>, vector<32x8xf32>, vector<18x8xf32> -> vector<18x8xf32>
    %c0_15 = arith.constant 0 : index
    %c0_16 = arith.constant 0 : index
    %29 = vector.load %arg5[%c0_15, %c0_16] : memref<1x96xf32, #tpu.memory_space<vmem>>, vector<1x8xf32>
    %30 = vector.broadcast %29 : vector<1x8xf32> to vector<18x8xf32>
    %31 = arith.addf %28, %30 : vector<18x8xf32>
    %c0_17 = arith.constant 0 : index
    %c32 = arith.constant 32 : index
    %32 = vector.load %arg4[%c0_17, %c32] : memref<32x96xf32, #tpu.memory_space<vmem>>, vector<32x8xf32>
    %cst_18 = arith.constant dense<0.000000e+00> : vector<18x8xf32>
    %33 = tpu.matmul %25, %32, %cst_18 {dimension_numbers = #tpu.dot_dimension_numbers<[1], [0], [0], [1], [0, 0, 1, 1], [], []>} : vector<18x32xf32>, vector<32x8xf32>, vector<18x8xf32> -> vector<18x8xf32>
    %c0_19 = arith.constant 0 : index
    %c32_20 = arith.constant 32 : index
    %34 = vector.load %arg5[%c0_19, %c32_20] : memref<1x96xf32, #tpu.memory_space<vmem>>, vector<1x8xf32>
    %35 = vector.broadcast %34 : vector<1x8xf32> to vector<18x8xf32>
    %36 = arith.addf %33, %35 : vector<18x8xf32>
    %c0_21 = arith.constant 0 : index
    %c64 = arith.constant 64 : index
    %37 = vector.load %arg4[%c0_21, %c64] : memref<32x96xf32, #tpu.memory_space<vmem>>, vector<32x8xf32>
    %cst_22 = arith.constant dense<0.000000e+00> : vector<18x8xf32>
    %38 = tpu.matmul %25, %37, %cst_22 {dimension_numbers = #tpu.dot_dimension_numbers<[1], [0], [0], [1], [0, 0, 1, 1], [], []>} : vector<18x32xf32>, vector<32x8xf32>, vector<18x8xf32> -> vector<18x8xf32>
    %c0_23 = arith.constant 0 : index
    %c64_24 = arith.constant 64 : index
    %39 = vector.load %arg5[%c0_23, %c64_24] : memref<1x96xf32, #tpu.memory_space<vmem>>, vector<1x8xf32>
    %40 = vector.broadcast %39 : vector<1x8xf32> to vector<18x8xf32>
    %41 = arith.addf %38, %40 : vector<18x8xf32>
    %cst_25 = arith.constant dense<0.000000e+00> : vector<18x18xf32>
    %42 = tpu.matmul %31, %36, %cst_25 {dimension_numbers = #tpu.dot_dimension_numbers<[1], [1], [0], [0], [0, 0, 1, 0], [], []>} : vector<18x8xf32>, vector<18x8xf32>, vector<18x18xf32> -> vector<18x18xf32>
    %cst_26 = arith.constant 0.353553385 : f32
    %43 = vector.broadcast %cst_26 : f32 to vector<18x18xf32>
    %44 = arith.mulf %42, %43 : vector<18x18xf32>
    %45 = arith.addf %44, %1 : vector<18x18xf32>
    %cst_27 = arith.constant dense<0xFF800000> : vector<18xf32>
    %46 = vector.multi_reduction <maximumf>, %45, %cst_27 [1] : vector<18x18xf32> to vector<18xf32>
    %47 = vector.shape_cast %46 : vector<18xf32> to vector<18x1xf32>
    %48 = vector.broadcast %47 : vector<18x1xf32> to vector<18x18xf32>
    %49 = arith.subf %45, %48 : vector<18x18xf32>
    %50 = math.exp %49 : vector<18x18xf32>
    %cst_28 = arith.constant dense<0.000000e+00> : vector<18xf32>
    %51 = vector.multi_reduction <add>, %50, %cst_28 [1] : vector<18x18xf32> to vector<18xf32>
    %52 = vector.shape_cast %51 : vector<18xf32> to vector<18x1xf32>
    %53 = tpu.reciprocal %52 {approx = true} : vector<18x1xf32> -> vector<18x1xf32>
    %54 = vector.broadcast %53 : vector<18x1xf32> to vector<18x18xf32>
    %55 = arith.mulf %50, %54 : vector<18x18xf32>
    %cst_29 = arith.constant dense<0.000000e+00> : vector<18x8xf32>
    %56 = tpu.matmul %55, %41, %cst_29 {dimension_numbers = #tpu.dot_dimension_numbers<[1], [0], [0], [1], [0, 0, 1, 1], [], []>} : vector<18x18xf32>, vector<18x8xf32>, vector<18x8xf32> -> vector<18x8xf32>
    %c0_30 = arith.constant 0 : index
    %c0_31 = arith.constant 0 : index
    %57 = vector.load %arg6[%c0_30, %c0_31] : memref<32x32xf32, #tpu.memory_space<vmem>>, vector<8x32xf32>
    %cst_32 = arith.constant dense<0.000000e+00> : vector<18x32xf32>
    %58 = tpu.matmul %56, %57, %cst_32 {dimension_numbers = #tpu.dot_dimension_numbers<[1], [0], [0], [1], [0, 0, 1, 1], [], []>} : vector<18x8xf32>, vector<8x32xf32>, vector<18x32xf32> -> vector<18x32xf32>
    %59 = arith.addf %26, %58 : vector<18x32xf32>
    %c0_33 = arith.constant 0 : index
    %c8 = arith.constant 8 : index
    %60 = vector.load %arg4[%c0_33, %c8] : memref<32x96xf32, #tpu.memory_space<vmem>>, vector<32x8xf32>
    %cst_34 = arith.constant dense<0.000000e+00> : vector<18x8xf32>
    %61 = tpu.matmul %25, %60, %cst_34 {dimension_numbers = #tpu.dot_dimension_numbers<[1], [0], [0], [1], [0, 0, 1, 1], [], []>} : vector<18x32xf32>, vector<32x8xf32>, vector<18x8xf32> -> vector<18x8xf32>
    %c0_35 = arith.constant 0 : index
    %c8_36 = arith.constant 8 : index
    %62 = vector.load %arg5[%c0_35, %c8_36] : memref<1x96xf32, #tpu.memory_space<vmem>>, vector<1x8xf32>
    %63 = vector.broadcast %62 : vector<1x8xf32> to vector<18x8xf32>
    %64 = arith.addf %61, %63 : vector<18x8xf32>
    %c0_37 = arith.constant 0 : index
    %c40 = arith.constant 40 : index
    %65 = vector.load %arg4[%c0_37, %c40] : memref<32x96xf32, #tpu.memory_space<vmem>>, vector<32x8xf32>
    %cst_38 = arith.constant dense<0.000000e+00> : vector<18x8xf32>
    %66 = tpu.matmul %25, %65, %cst_38 {dimension_numbers = #tpu.dot_dimension_numbers<[1], [0], [0], [1], [0, 0, 1, 1], [], []>} : vector<18x32xf32>, vector<32x8xf32>, vector<18x8xf32> -> vector<18x8xf32>
    %c0_39 = arith.constant 0 : index
    %c40_40 = arith.constant 40 : index
    %67 = vector.load %arg5[%c0_39, %c40_40] : memref<1x96xf32, #tpu.memory_space<vmem>>, vector<1x8xf32>
    %68 = vector.broadcast %67 : vector<1x8xf32> to vector<18x8xf32>
    %69 = arith.addf %66, %68 : vector<18x8xf32>
    %c0_41 = arith.constant 0 : index
    %c72 = arith.constant 72 : index
    %70 = vector.load %arg4[%c0_41, %c72] : memref<32x96xf32, #tpu.memory_space<vmem>>, vector<32x8xf32>
    %cst_42 = arith.constant dense<0.000000e+00> : vector<18x8xf32>
    %71 = tpu.matmul %25, %70, %cst_42 {dimension_numbers = #tpu.dot_dimension_numbers<[1], [0], [0], [1], [0, 0, 1, 1], [], []>} : vector<18x32xf32>, vector<32x8xf32>, vector<18x8xf32> -> vector<18x8xf32>
    %c0_43 = arith.constant 0 : index
    %c72_44 = arith.constant 72 : index
    %72 = vector.load %arg5[%c0_43, %c72_44] : memref<1x96xf32, #tpu.memory_space<vmem>>, vector<1x8xf32>
    %73 = vector.broadcast %72 : vector<1x8xf32> to vector<18x8xf32>
    %74 = arith.addf %71, %73 : vector<18x8xf32>
    %cst_45 = arith.constant dense<0.000000e+00> : vector<18x18xf32>
    %75 = tpu.matmul %64, %69, %cst_45 {dimension_numbers = #tpu.dot_dimension_numbers<[1], [1], [0], [0], [0, 0, 1, 0], [], []>} : vector<18x8xf32>, vector<18x8xf32>, vector<18x18xf32> -> vector<18x18xf32>
    %cst_46 = arith.constant 0.353553385 : f32
    %76 = vector.broadcast %cst_46 : f32 to vector<18x18xf32>
    %77 = arith.mulf %75, %76 : vector<18x18xf32>
    %78 = arith.addf %77, %1 : vector<18x18xf32>
    %cst_47 = arith.constant dense<0xFF800000> : vector<18xf32>
    %79 = vector.multi_reduction <maximumf>, %78, %cst_47 [1] : vector<18x18xf32> to vector<18xf32>
    %80 = vector.shape_cast %79 : vector<18xf32> to vector<18x1xf32>
    %81 = vector.broadcast %80 : vector<18x1xf32> to vector<18x18xf32>
    %82 = arith.subf %78, %81 : vector<18x18xf32>
    %83 = math.exp %82 : vector<18x18xf32>
    %cst_48 = arith.constant dense<0.000000e+00> : vector<18xf32>
    %84 = vector.multi_reduction <add>, %83, %cst_48 [1] : vector<18x18xf32> to vector<18xf32>
    %85 = vector.shape_cast %84 : vector<18xf32> to vector<18x1xf32>
    %86 = tpu.reciprocal %85 {approx = true} : vector<18x1xf32> -> vector<18x1xf32>
    %87 = vector.broadcast %86 : vector<18x1xf32> to vector<18x18xf32>
    %88 = arith.mulf %83, %87 : vector<18x18xf32>
    %cst_49 = arith.constant dense<0.000000e+00> : vector<18x8xf32>
    %89 = tpu.matmul %88, %74, %cst_49 {dimension_numbers = #tpu.dot_dimension_numbers<[1], [0], [0], [1], [0, 0, 1, 1], [], []>} : vector<18x18xf32>, vector<18x8xf32>, vector<18x8xf32> -> vector<18x8xf32>
    %c8_50 = arith.constant 8 : index
    %c0_51 = arith.constant 0 : index
    %90 = vector.load %arg6[%c8_50, %c0_51] : memref<32x32xf32, #tpu.memory_space<vmem>>, vector<8x32xf32>
    %cst_52 = arith.constant dense<0.000000e+00> : vector<18x32xf32>
    %91 = tpu.matmul %89, %90, %cst_52 {dimension_numbers = #tpu.dot_dimension_numbers<[1], [0], [0], [1], [0, 0, 1, 1], [], []>} : vector<18x8xf32>, vector<8x32xf32>, vector<18x32xf32> -> vector<18x32xf32>
    %92 = arith.addf %59, %91 : vector<18x32xf32>
    %c0_53 = arith.constant 0 : index
    %c16 = arith.constant 16 : index
    %93 = vector.load %arg4[%c0_53, %c16] : memref<32x96xf32, #tpu.memory_space<vmem>>, vector<32x8xf32>
    %cst_54 = arith.constant dense<0.000000e+00> : vector<18x8xf32>
    %94 = tpu.matmul %25, %93, %cst_54 {dimension_numbers = #tpu.dot_dimension_numbers<[1], [0], [0], [1], [0, 0, 1, 1], [], []>} : vector<18x32xf32>, vector<32x8xf32>, vector<18x8xf32> -> vector<18x8xf32>
    %c0_55 = arith.constant 0 : index
    %c16_56 = arith.constant 16 : index
    %95 = vector.load %arg5[%c0_55, %c16_56] : memref<1x96xf32, #tpu.memory_space<vmem>>, vector<1x8xf32>
    %96 = vector.broadcast %95 : vector<1x8xf32> to vector<18x8xf32>
    %97 = arith.addf %94, %96 : vector<18x8xf32>
    %c0_57 = arith.constant 0 : index
    %c48 = arith.constant 48 : index
    %98 = vector.load %arg4[%c0_57, %c48] : memref<32x96xf32, #tpu.memory_space<vmem>>, vector<32x8xf32>
    %cst_58 = arith.constant dense<0.000000e+00> : vector<18x8xf32>
    %99 = tpu.matmul %25, %98, %cst_58 {dimension_numbers = #tpu.dot_dimension_numbers<[1], [0], [0], [1], [0, 0, 1, 1], [], []>} : vector<18x32xf32>, vector<32x8xf32>, vector<18x8xf32> -> vector<18x8xf32>
    %c0_59 = arith.constant 0 : index
    %c48_60 = arith.constant 48 : index
    %100 = vector.load %arg5[%c0_59, %c48_60] : memref<1x96xf32, #tpu.memory_space<vmem>>, vector<1x8xf32>
    %101 = vector.broadcast %100 : vector<1x8xf32> to vector<18x8xf32>
    %102 = arith.addf %99, %101 : vector<18x8xf32>
    %c0_61 = arith.constant 0 : index
    %c80 = arith.constant 80 : index
    %103 = vector.load %arg4[%c0_61, %c80] : memref<32x96xf32, #tpu.memory_space<vmem>>, vector<32x8xf32>
    %cst_62 = arith.constant dense<0.000000e+00> : vector<18x8xf32>
    %104 = tpu.matmul %25, %103, %cst_62 {dimension_numbers = #tpu.dot_dimension_numbers<[1], [0], [0], [1], [0, 0, 1, 1], [], []>} : vector<18x32xf32>, vector<32x8xf32>, vector<18x8xf32> -> vector<18x8xf32>
    %c0_63 = arith.constant 0 : index
    %c80_64 = arith.constant 80 : index
    %105 = vector.load %arg5[%c0_63, %c80_64] : memref<1x96xf32, #tpu.memory_space<vmem>>, vector<1x8xf32>
    %106 = vector.broadcast %105 : vector<1x8xf32> to vector<18x8xf32>
    %107 = arith.addf %104, %106 : vector<18x8xf32>
    %cst_65 = arith.constant dense<0.000000e+00> : vector<18x18xf32>
    %108 = tpu.matmul %97, %102, %cst_65 {dimension_numbers = #tpu.dot_dimension_numbers<[1], [1], [0], [0], [0, 0, 1, 0], [], []>} : vector<18x8xf32>, vector<18x8xf32>, vector<18x18xf32> -> vector<18x18xf32>
    %cst_66 = arith.constant 0.353553385 : f32
    %109 = vector.broadcast %cst_66 : f32 to vector<18x18xf32>
    %110 = arith.mulf %108, %109 : vector<18x18xf32>
    %111 = arith.addf %110, %1 : vector<18x18xf32>
    %cst_67 = arith.constant dense<0xFF800000> : vector<18xf32>
    %112 = vector.multi_reduction <maximumf>, %111, %cst_67 [1] : vector<18x18xf32> to vector<18xf32>
    %113 = vector.shape_cast %112 : vector<18xf32> to vector<18x1xf32>
    %114 = vector.broadcast %113 : vector<18x1xf32> to vector<18x18xf32>
    %115 = arith.subf %111, %114 : vector<18x18xf32>
    %116 = math.exp %115 : vector<18x18xf32>
    %cst_68 = arith.constant dense<0.000000e+00> : vector<18xf32>
    %117 = vector.multi_reduction <add>, %116, %cst_68 [1] : vector<18x18xf32> to vector<18xf32>
    %118 = vector.shape_cast %117 : vector<18xf32> to vector<18x1xf32>
    %119 = tpu.reciprocal %118 {approx = true} : vector<18x1xf32> -> vector<18x1xf32>
    %120 = vector.broadcast %119 : vector<18x1xf32> to vector<18x18xf32>
    %121 = arith.mulf %116, %120 : vector<18x18xf32>
    %cst_69 = arith.constant dense<0.000000e+00> : vector<18x8xf32>
    %122 = tpu.matmul %121, %107, %cst_69 {dimension_numbers = #tpu.dot_dimension_numbers<[1], [0], [0], [1], [0, 0, 1, 1], [], []>} : vector<18x18xf32>, vector<18x8xf32>, vector<18x8xf32> -> vector<18x8xf32>
    %c16_70 = arith.constant 16 : index
    %c0_71 = arith.constant 0 : index
    %123 = vector.load %arg6[%c16_70, %c0_71] : memref<32x32xf32, #tpu.memory_space<vmem>>, vector<8x32xf32>
    %cst_72 = arith.constant dense<0.000000e+00> : vector<18x32xf32>
    %124 = tpu.matmul %122, %123, %cst_72 {dimension_numbers = #tpu.dot_dimension_numbers<[1], [0], [0], [1], [0, 0, 1, 1], [], []>} : vector<18x8xf32>, vector<8x32xf32>, vector<18x32xf32> -> vector<18x32xf32>
    %125 = arith.addf %92, %124 : vector<18x32xf32>
    %c0_73 = arith.constant 0 : index
    %c24 = arith.constant 24 : index
    %126 = vector.load %arg4[%c0_73, %c24] : memref<32x96xf32, #tpu.memory_space<vmem>>, vector<32x8xf32>
    %cst_74 = arith.constant dense<0.000000e+00> : vector<18x8xf32>
    %127 = tpu.matmul %25, %126, %cst_74 {dimension_numbers = #tpu.dot_dimension_numbers<[1], [0], [0], [1], [0, 0, 1, 1], [], []>} : vector<18x32xf32>, vector<32x8xf32>, vector<18x8xf32> -> vector<18x8xf32>
    %c0_75 = arith.constant 0 : index
    %c24_76 = arith.constant 24 : index
    %128 = vector.load %arg5[%c0_75, %c24_76] : memref<1x96xf32, #tpu.memory_space<vmem>>, vector<1x8xf32>
    %129 = vector.broadcast %128 : vector<1x8xf32> to vector<18x8xf32>
    %130 = arith.addf %127, %129 : vector<18x8xf32>
    %c0_77 = arith.constant 0 : index
    %c56 = arith.constant 56 : index
    %131 = vector.load %arg4[%c0_77, %c56] : memref<32x96xf32, #tpu.memory_space<vmem>>, vector<32x8xf32>
    %cst_78 = arith.constant dense<0.000000e+00> : vector<18x8xf32>
    %132 = tpu.matmul %25, %131, %cst_78 {dimension_numbers = #tpu.dot_dimension_numbers<[1], [0], [0], [1], [0, 0, 1, 1], [], []>} : vector<18x32xf32>, vector<32x8xf32>, vector<18x8xf32> -> vector<18x8xf32>
    %c0_79 = arith.constant 0 : index
    %c56_80 = arith.constant 56 : index
    %133 = vector.load %arg5[%c0_79, %c56_80] : memref<1x96xf32, #tpu.memory_space<vmem>>, vector<1x8xf32>
    %134 = vector.broadcast %133 : vector<1x8xf32> to vector<18x8xf32>
    %135 = arith.addf %132, %134 : vector<18x8xf32>
    %c0_81 = arith.constant 0 : index
    %c88 = arith.constant 88 : index
    %136 = vector.load %arg4[%c0_81, %c88] : memref<32x96xf32, #tpu.memory_space<vmem>>, vector<32x8xf32>
    %cst_82 = arith.constant dense<0.000000e+00> : vector<18x8xf32>
    %137 = tpu.matmul %25, %136, %cst_82 {dimension_numbers = #tpu.dot_dimension_numbers<[1], [0], [0], [1], [0, 0, 1, 1], [], []>} : vector<18x32xf32>, vector<32x8xf32>, vector<18x8xf32> -> vector<18x8xf32>
    %c0_83 = arith.constant 0 : index
    %c88_84 = arith.constant 88 : index
    %138 = vector.load %arg5[%c0_83, %c88_84] : memref<1x96xf32, #tpu.memory_space<vmem>>, vector<1x8xf32>
    %139 = vector.broadcast %138 : vector<1x8xf32> to vector<18x8xf32>
    %140 = arith.addf %137, %139 : vector<18x8xf32>
    %cst_85 = arith.constant dense<0.000000e+00> : vector<18x18xf32>
    %141 = tpu.matmul %130, %135, %cst_85 {dimension_numbers = #tpu.dot_dimension_numbers<[1], [1], [0], [0], [0, 0, 1, 0], [], []>} : vector<18x8xf32>, vector<18x8xf32>, vector<18x18xf32> -> vector<18x18xf32>
    %cst_86 = arith.constant 0.353553385 : f32
    %142 = vector.broadcast %cst_86 : f32 to vector<18x18xf32>
    %143 = arith.mulf %141, %142 : vector<18x18xf32>
    %144 = arith.addf %143, %1 : vector<18x18xf32>
    %cst_87 = arith.constant dense<0xFF800000> : vector<18xf32>
    %145 = vector.multi_reduction <maximumf>, %144, %cst_87 [1] : vector<18x18xf32> to vector<18xf32>
    %146 = vector.shape_cast %145 : vector<18xf32> to vector<18x1xf32>
    %147 = vector.broadcast %146 : vector<18x1xf32> to vector<18x18xf32>
    %148 = arith.subf %144, %147 : vector<18x18xf32>
    %149 = math.exp %148 : vector<18x18xf32>
    %cst_88 = arith.constant dense<0.000000e+00> : vector<18xf32>
    %150 = vector.multi_reduction <add>, %149, %cst_88 [1] : vector<18x18xf32> to vector<18xf32>
    %151 = vector.shape_cast %150 : vector<18xf32> to vector<18x1xf32>
    %152 = tpu.reciprocal %151 {approx = true} : vector<18x1xf32> -> vector<18x1xf32>
    %153 = vector.broadcast %152 : vector<18x1xf32> to vector<18x18xf32>
    %154 = arith.mulf %149, %153 : vector<18x18xf32>
    %cst_89 = arith.constant dense<0.000000e+00> : vector<18x8xf32>
    %155 = tpu.matmul %154, %140, %cst_89 {dimension_numbers = #tpu.dot_dimension_numbers<[1], [0], [0], [1], [0, 0, 1, 1], [], []>} : vector<18x18xf32>, vector<18x8xf32>, vector<18x8xf32> -> vector<18x8xf32>
    %c24_90 = arith.constant 24 : index
    %c0_91 = arith.constant 0 : index
    %156 = vector.load %arg6[%c24_90, %c0_91] : memref<32x32xf32, #tpu.memory_space<vmem>>, vector<8x32xf32>
    %cst_92 = arith.constant dense<0.000000e+00> : vector<18x32xf32>
    %157 = tpu.matmul %155, %156, %cst_92 {dimension_numbers = #tpu.dot_dimension_numbers<[1], [0], [0], [1], [0, 0, 1, 1], [], []>} : vector<18x8xf32>, vector<8x32xf32>, vector<18x32xf32> -> vector<18x32xf32>
    %158 = arith.addf %125, %157 : vector<18x32xf32>
    %c0_93 = arith.constant 0 : index
    %c0_94 = arith.constant 0 : index
    %159 = vector.load %arg7[%c0_93, %c0_94] : memref<1x32xf32, #tpu.memory_space<vmem>>, vector<1x32xf32>
    %160 = vector.broadcast %159 : vector<1x32xf32> to vector<18x32xf32>
    %161 = arith.addf %158, %160 : vector<18x32xf32>
    %c0_95 = arith.constant 0 : index
    %c0_96 = arith.constant 0 : index
    %162 = vector.load %arg8[%c0_95, %c0_96] : memref<32x16xf32, #tpu.memory_space<vmem>>, vector<32x16xf32>
    %cst_97 = arith.constant dense<0.000000e+00> : vector<18x16xf32>
    %163 = tpu.matmul %161, %162, %cst_97 {dimension_numbers = #tpu.dot_dimension_numbers<[1], [0], [0], [1], [0, 0, 1, 1], [], []>} : vector<18x32xf32>, vector<32x16xf32>, vector<18x16xf32> -> vector<18x16xf32>
    %c0_98 = arith.constant 0 : index
    %c0_99 = arith.constant 0 : index
    %164 = vector.load %arg9[%c0_98, %c0_99] : memref<1x16xf32, #tpu.memory_space<vmem>>, vector<1x16xf32>
    %165 = vector.broadcast %164 : vector<1x16xf32> to vector<18x16xf32>
    %166 = arith.addf %163, %165 : vector<18x16xf32>
    %cst_100 = arith.constant 5.000000e-01 : f32
    %167 = vector.broadcast %cst_100 : f32 to vector<18x16xf32>
    %168 = arith.mulf %167, %166 : vector<18x16xf32>
    %cst_101 = arith.constant 0.636619746 : f32
    %169 = math.sqrt %cst_101 : f32
    %cst_102 = arith.constant 4.471500e-02 : f32
    %170 = vector.broadcast %cst_102 : f32 to vector<18x16xf32>
    %171 = arith.mulf %170, %166 : vector<18x16xf32>
    %172 = arith.mulf %171, %166 : vector<18x16xf32>
    %173 = arith.mulf %172, %166 : vector<18x16xf32>
    %174 = arith.addf %166, %173 : vector<18x16xf32>
    %175 = vector.broadcast %169 : f32 to vector<18x16xf32>
    %176 = arith.mulf %175, %174 : vector<18x16xf32>
    %177 = math.tanh %176 : vector<18x16xf32>
    %cst_103 = arith.constant 1.000000e+00 : f32
    %178 = vector.broadcast %cst_103 : f32 to vector<18x16xf32>
    %179 = arith.addf %178, %177 : vector<18x16xf32>
    %180 = arith.mulf %168, %179 : vector<18x16xf32>
    %c0_104 = arith.constant 0 : index
    %c0_105 = arith.constant 0 : index
    %181 = vector.load %arg10[%c0_104, %c0_105] : memref<16x32xf32, #tpu.memory_space<vmem>>, vector<16x32xf32>
    %cst_106 = arith.constant dense<0.000000e+00> : vector<18x32xf32>
    %182 = tpu.matmul %180, %181, %cst_106 {dimension_numbers = #tpu.dot_dimension_numbers<[1], [0], [0], [1], [0, 0, 1, 1], [], []>} : vector<18x16xf32>, vector<16x32xf32>, vector<18x32xf32> -> vector<18x32xf32>
    %cst_107 = arith.constant 0.000000e+00 : f32
    %183 = vector.broadcast %cst_107 : f32 to vector<18x32xf32>
    %184 = arith.addf %182, %183 : vector<18x32xf32>
    %c0_108 = arith.constant 0 : index
    %c0_109 = arith.constant 0 : index
    %185 = vector.load %arg11[%c0_108, %c0_109] : memref<1x32xf32, #tpu.memory_space<vmem>>, vector<1x32xf32>
    %186 = vector.broadcast %185 : vector<1x32xf32> to vector<18x32xf32>
    %187 = arith.addf %184, %186 : vector<18x32xf32>
    %188 = arith.addf %0, %161 : vector<18x32xf32>
    %189 = arith.addf %188, %187 : vector<18x32xf32>
    %c0_110 = arith.constant 0 : index
    %c0_111 = arith.constant 0 : index
    %190 = vector.load %arg12[%c0_110, %c0_111] : memref<1x32xf32, #tpu.memory_space<vmem>>, vector<1x32xf32>
    %c0_112 = arith.constant 0 : index
    %c0_113 = arith.constant 0 : index
    %191 = vector.load %arg13[%c0_112, %c0_113] : memref<1x32xf32, #tpu.memory_space<vmem>>, vector<1x32xf32>
    %cst_114 = arith.constant dense<0.000000e+00> : vector<18xf32>
    %192 = vector.multi_reduction <add>, %189, %cst_114 [1] : vector<18x32xf32> to vector<18xf32>
    %193 = vector.shape_cast %192 : vector<18xf32> to vector<18x1xf32>
    %cst_115 = arith.constant 3.200000e+01 : f32
    %194 = vector.broadcast %cst_115 : f32 to vector<18x1xf32>
    %195 = arith.divf %193, %194 : vector<18x1xf32>
    %196 = vector.broadcast %195 : vector<18x1xf32> to vector<18x32xf32>
    %197 = arith.subf %189, %196 : vector<18x32xf32>
    %198 = arith.mulf %197, %197 : vector<18x32xf32>
    %cst_116 = arith.constant dense<0.000000e+00> : vector<18xf32>
    %199 = vector.multi_reduction <add>, %198, %cst_116 [1] : vector<18x32xf32> to vector<18xf32>
    %200 = vector.shape_cast %199 : vector<18xf32> to vector<18x1xf32>
    %cst_117 = arith.constant 3.200000e+01 : f32
    %201 = vector.broadcast %cst_117 : f32 to vector<18x1xf32>
    %202 = arith.divf %200, %201 : vector<18x1xf32>
    %203 = vector.broadcast %195 : vector<18x1xf32> to vector<18x32xf32>
    %204 = arith.subf %189, %203 : vector<18x32xf32>
    %cst_118 = arith.constant 9.99999974E-6 : f32
    %205 = vector.broadcast %cst_118 : f32 to vector<18x1xf32>
    %206 = arith.addf %202, %205 : vector<18x1xf32>
    %207 = math.rsqrt %206 : vector<18x1xf32>
    %208 = vector.broadcast %207 : vector<18x1xf32> to vector<18x32xf32>
    %209 = arith.mulf %204, %208 : vector<18x32xf32>
    %210 = vector.broadcast %190 : vector<1x32xf32> to vector<18x32xf32>
    %211 = arith.mulf %209, %210 : vector<18x32xf32>
    %212 = vector.broadcast %191 : vector<1x32xf32> to vector<18x32xf32>
    %213 = arith.addf %211, %212 : vector<18x32xf32>
    %c0_119 = arith.constant 0 : index
    %c0_120 = arith.constant 0 : index
    %214 = vector.load %arg14[%c0_119, %c0_120] : memref<32x128xf32, #tpu.memory_space<vmem>>, vector<32x128xf32>
    %cst_121 = arith.constant dense<0.000000e+00> : vector<18x128xf32>
    %215 = tpu.matmul %213, %214, %cst_121 {dimension_numbers = #tpu.dot_dimension_numbers<[1], [0], [0], [1], [0, 0, 1, 1], [], []>} : vector<18x32xf32>, vector<32x128xf32>, vector<18x128xf32> -> vector<18x128xf32>
    %c0_122 = arith.constant 0 : index
    %c0_123 = arith.constant 0 : index
    %216 = vector.load %arg15[%c0_122, %c0_123] : memref<1x128xf32, #tpu.memory_space<vmem>>, vector<1x128xf32>
    %217 = vector.broadcast %216 : vector<1x128xf32> to vector<18x128xf32>
    %218 = arith.addf %215, %217 : vector<18x128xf32>
    %cst_124 = arith.constant 5.000000e-01 : f32
    %219 = vector.broadcast %cst_124 : f32 to vector<18x128xf32>
    %220 = arith.mulf %219, %218 : vector<18x128xf32>
    %cst_125 = arith.constant 0.636619746 : f32
    %221 = math.sqrt %cst_125 : f32
    %cst_126 = arith.constant 4.471500e-02 : f32
    %222 = vector.broadcast %cst_126 : f32 to vector<18x128xf32>
    %223 = arith.mulf %222, %218 : vector<18x128xf32>
    %224 = arith.mulf %223, %218 : vector<18x128xf32>
    %225 = arith.mulf %224, %218 : vector<18x128xf32>
    %226 = arith.addf %218, %225 : vector<18x128xf32>
    %227 = vector.broadcast %221 : f32 to vector<18x128xf32>
    %228 = arith.mulf %227, %226 : vector<18x128xf32>
    %229 = math.tanh %228 : vector<18x128xf32>
    %cst_127 = arith.constant 1.000000e+00 : f32
    %230 = vector.broadcast %cst_127 : f32 to vector<18x128xf32>
    %231 = arith.addf %230, %229 : vector<18x128xf32>
    %232 = arith.mulf %220, %231 : vector<18x128xf32>
    %c0_128 = arith.constant 0 : index
    %c0_129 = arith.constant 0 : index
    %233 = vector.load %arg16[%c0_128, %c0_129] : memref<128x32xf32, #tpu.memory_space<vmem>>, vector<128x32xf32>
    %cst_130 = arith.constant dense<0.000000e+00> : vector<18x32xf32>
    %234 = tpu.matmul %232, %233, %cst_130 {dimension_numbers = #tpu.dot_dimension_numbers<[1], [0], [0], [1], [0, 0, 1, 1], [], []>} : vector<18x128xf32>, vector<128x32xf32>, vector<18x32xf32> -> vector<18x32xf32>
    %c0_131 = arith.constant 0 : index
    %c0_132 = arith.constant 0 : index
    %235 = vector.load %arg17[%c0_131, %c0_132] : memref<1x32xf32, #tpu.memory_space<vmem>>, vector<1x32xf32>
    %236 = vector.broadcast %235 : vector<1x32xf32> to vector<18x32xf32>
    %237 = arith.addf %234, %236 : vector<18x32xf32>
    %c0_133 = arith.constant 0 : index
    %c0_134 = arith.constant 0 : index
    %238 = vector.load %arg18[%c0_133, %c0_134] : memref<32x16xf32, #tpu.memory_space<vmem>>, vector<32x16xf32>
    %cst_135 = arith.constant dense<0.000000e+00> : vector<18x16xf32>
    %239 = tpu.matmul %237, %238, %cst_135 {dimension_numbers = #tpu.dot_dimension_numbers<[1], [0], [0], [1], [0, 0, 1, 1], [], []>} : vector<18x32xf32>, vector<32x16xf32>, vector<18x16xf32> -> vector<18x16xf32>
    %c0_136 = arith.constant 0 : index
    %c0_137 = arith.constant 0 : index
    %240 = vector.load %arg19[%c0_136, %c0_137] : memref<1x16xf32, #tpu.memory_space<vmem>>, vector<1x16xf32>
    %241 = vector.broadcast %240 : vector<1x16xf32> to vector<18x16xf32>
    %242 = arith.addf %239, %241 : vector<18x16xf32>
    %cst_138 = arith.constant 5.000000e-01 : f32
    %243 = vector.broadcast %cst_138 : f32 to vector<18x16xf32>
    %244 = arith.mulf %243, %242 : vector<18x16xf32>
    %cst_139 = arith.constant 0.636619746 : f32
    %245 = math.sqrt %cst_139 : f32
    %cst_140 = arith.constant 4.471500e-02 : f32
    %246 = vector.broadcast %cst_140 : f32 to vector<18x16xf32>
    %247 = arith.mulf %246, %242 : vector<18x16xf32>
    %248 = arith.mulf %247, %242 : vector<18x16xf32>
    %249 = arith.mulf %248, %242 : vector<18x16xf32>
    %250 = arith.addf %242, %249 : vector<18x16xf32>
    %251 = vector.broadcast %245 : f32 to vector<18x16xf32>
    %252 = arith.mulf %251, %250 : vector<18x16xf32>
    %253 = math.tanh %252 : vector<18x16xf32>
    %cst_141 = arith.constant 1.000000e+00 : f32
    %254 = vector.broadcast %cst_141 : f32 to vector<18x16xf32>
    %255 = arith.addf %254, %253 : vector<18x16xf32>
    %256 = arith.mulf %244, %255 : vector<18x16xf32>
    %c0_142 = arith.constant 0 : index
    %c0_143 = arith.constant 0 : index
    %257 = vector.load %arg20[%c0_142, %c0_143] : memref<16x32xf32, #tpu.memory_space<vmem>>, vector<16x32xf32>
    %cst_144 = arith.constant dense<0.000000e+00> : vector<18x32xf32>
    %258 = tpu.matmul %256, %257, %cst_144 {dimension_numbers = #tpu.dot_dimension_numbers<[1], [0], [0], [1], [0, 0, 1, 1], [], []>} : vector<18x16xf32>, vector<16x32xf32>, vector<18x32xf32> -> vector<18x32xf32>
    %c0_145 = arith.constant 0 : index
    %c0_146 = arith.constant 0 : index
    %259 = vector.load %arg21[%c0_145, %c0_146] : memref<1x32xf32, #tpu.memory_space<vmem>>, vector<1x32xf32>
    %260 = vector.broadcast %259 : vector<1x32xf32> to vector<18x32xf32>
    %261 = arith.addf %258, %260 : vector<18x32xf32>
    %262 = arith.addf %189, %237 : vector<18x32xf32>
    %263 = arith.addf %262, %261 : vector<18x32xf32>
    %c0_147 = arith.constant 0 : index
    %c0_148 = arith.constant 0 : index
    %264 = vector.load %arg22[%c0_147, %c0_148] : memref<18x32xf32, #tpu.memory_space<vmem>>, vector<18x32xf32>
    tpu.vector_store %arg22[%c0_147, %c0_148], %263 {strides = array<i32>} : memref<18x32xf32, #tpu.memory_space<vmem>>, vector<18x32xf32>,
    return
  }
}

</mosaic_0001>

<bundles_post_ra>
// kernel: forward.4
= control target key start
LH: loop header
LB: loop body
LE: loop exit
PB: predicated region body
PF: predicated region fallthrough
CT: control target
= control target key end

     0   :  { %v164_v0 = vmov 0   ;;  %vm34_vm0 = vcmask 392192   ;;  %v60_v26 = vlaneseq  ;;  %v165_v29 = vmov 1.0   ;;  %s297_s3 = inlined_call_operand.vmem [shape: s32[16,1], index: 3, kind: input, shape index: {}]   ;;  %s298_s4 = inlined_call_operand.vmem [shape: f32[128,32], index: 4, kind: input, shape index: {}]   ;;  %s299_s1 = inlined_call_operand.vmem [shape: f32[48,32], index: 1, kind: input, shape index: {}]   ;;  %s300_s2 = inlined_call_operand.vmem [shape: f32[1,32], index: 2, kind: input, shape index: {}]   ;;  %s301_s0 = inlined_call_operand.vmem [shape: f32[2,48], index: 0, kind: input, shape index: {}]   ;;  %s302_s5 = inlined_call_operand.vmem [shape: f32[32,32], index: 5, kind: input, shape index: {}]   ;;  %s303_s6 = inlined_call_operand.vmem [shape: f32[18,32], index: 6, kind: output, shape index: {}]  }
   0x1   :  { %162 = vset.pattern.permute.xlu0 %v164_v0  ;;  %v59_v1 = vld [vmem:[%s297_s3 + $0x8] sm:$0xff]  ;;  %v89_v2 = vld [vmem:[%s298_s4 + $0x78] sm:$0xff]  ;;  %v88_v3 = vld [vmem:[%s298_s4 + $0x70] sm:$0xff]  ;;  %vm116_vm3 = vcmask 253952   ;;  %vm131_vm4 = vcmask 254977   ;;  %vm120_vm5 = vcmask 1046528  }
   0x2   :  { %66 = vperm.xlu0 %162, %v59_v1   ;;  %144 = vmatpush.msra.mxu2 %v89_v2  ;;  %v87_v4 = vld [vmem:[%s298_s4 + $0x68] sm:$0xff]  ;;  %v86_v5 = vld [vmem:[%s298_s4 + $0x60] sm:$0xff]  ;;  %v85_v9 = vld [vmem:[%s298_s4 + $0x58] sm:$0xff]  ;;  %v61_v27 = vand.u32 127, %v60_v26  ;;  %vm126_vm6 = vcmask 261120  }
   0x3   :  { %90 = vmatpush.msra.mxu1 %v89_v2  ;;  %v29_v6 = vld [vmem:[%s299_s1 + $0x28] sm:$0xff]  ;;  %v28_v7 = vld [vmem:[%s299_s1 + $0x20] sm:$0xff]  ;;  %v84_v10 = vld [vmem:[%s298_s4 + $0x50] sm:$0xff] }
   0x4   :  { %145 = vmatpush.msra.mxu2 %v88_v3  ;;  %v58_v8 = vld [vmem:[%s297_s3] sm:$0xff]  ;;  %48 = vmatpush.msra.mxu0 %v29_v6  ;;  %v83_v11 = vld [vmem:[%s298_s4 + $0x48] sm:$0xff]  ;;  %v81_v13 = vld [vmem:[%s298_s4 + $0x38] sm:$0xff] }
   0x5   :  { %91 = vmatpush.msra.mxu1 %v88_v3  ;;  %v82_v12 = vld [vmem:[%s298_s4 + $0x40] sm:$0xff]  ;;  %v80_v14 = vld [vmem:[%s298_s4 + $0x30] sm:$0xff]  ;;  %v79_v15 = vld [vmem:[%s298_s4 + $0x28] sm:$0xff] }
   0x6   :  { %146 = vmatpush.msra.mxu2 %v87_v4  ;;  %49 = vmatpush.msra.mxu0 %v28_v7  ;;  %v78_v16 = vld [vmem:[%s298_s4 + $0x20] sm:$0xff]  ;;  %v77_v17 = vld [vmem:[%s298_s4 + $0x18] sm:$0xff]  ;;  %v76_v18 = vld [vmem:[%s298_s4 + $0x10] sm:$0xff] }
   0x7   :  { %92 = vmatpush.msra.mxu1 %v87_v4  ;;  %v75_v19 = vld [vmem:[%s298_s4 + $0x8] sm:$0xff]  ;;  %v27_v20 = vld [vmem:[%s299_s1 + $0x18] sm:$0xff]  ;;  %v74_v21 = vld [vmem:[%s298_s4] sm:$0xff] }
   0x8   :  { %147 = vmatpush.msra.mxu2 %v86_v5  ;;  %50 = vmatpush.msra.mxu0 %v27_v20  ;;  %v26_v22 = vld [vmem:[%s299_s1 + $0x10] sm:$0xff]  ;;  %v25_v23 = vld [vmem:[%s299_s1 + $0x8] sm:$0xff]  ;;  %v24_v24 = vld [vmem:[%s299_s1] sm:$0xff] }
   0x9   :  { %93 = vmatpush.msra.mxu1 %v86_v5  ;;  %v23_v25 = vld [vmem:[%s301_s0] sm:$0x3]  ;;  %v114_v38 = vld [vmem:[%s302_s5 + $0x8] sm:$0xff] }
   0xa   :  { %63 = vperm.xlu0 %162, %v58_v8   ;;  %148 = vmatpush.msra.mxu2 %v85_v9  ;;  %v163_v31 = vld [vmem:[%s300_s2] ss:$0 sm:$0xff]  ;;  %v122_v40 = vrot.slane %v114_v38, 1 }
   0xb   :  { %94 = vmatpush.msra.mxu1 %v85_v9  ;;  %51 = vmatpush.msra.mxu0 %v26_v22  ;;  %v113_v32 = vld [vmem:[%s302_s5] sm:$0xff] }
   0xc   :  { %149 = vmatpush.msra.mxu2 %v84_v10  ;;  %v128_v33 = vrot.slane %v113_v32, 7  ;;  %v121_v39 = vrot.slane %v113_v32, 1 }
   0xd   :  { %95 = vmatpush.msra.mxu1 %v84_v10  ;;  %52 = vmatpush.msra.mxu0 %v25_v23 }
   0xe   :  { %150 = vmatpush.msra.mxu2 %v83_v11  ;;  %v123_v41 = vsel %vm120_vm5, %v121_v39, %v122_v40 }
   0xf   :  { %96 = vmatpush.msra.mxu1 %v83_v11  ;;  %53 = vmatpush.msra.mxu0 %v24_v24 }
  0x10   :  { %151 = vmatpush.msra.mxu2 %v82_v12  ;;  %139 = vmatmul.msk.f32.vlgmr.msra.gmra.mxu0 %vm34_vm0, %v23_v25 }
  0x11   :  { %97 = vmatpush.msra.mxu1 %v82_v12 }
  0x12   :  { %152 = vmatpush.msra.mxu2 %v81_v13 }
  0x13   :  { %98 = vmatpush.msra.mxu1 %v81_v13 }
  0x14   :  { %153 = vmatpush.msra.mxu2 %v80_v14 }
  0x15   :  { %99 = vmatpush.msra.mxu1 %v80_v14 }
  0x16   :  { %154 = vmatpush.msra.mxu2 %v79_v15 }
  0x17   :  { %100 = vmatpush.msra.mxu1 %v79_v15 }
  0x18   :  { %155 = vmatpush.msra.mxu2 %v78_v16 }
  0x19   :  { %101 = vmatpush.msra.mxu1 %v78_v16 }
  0x1a   :  { %156 = vmatpush.msra.mxu2 %v77_v17 }
  0x1b   :  { %102 = vmatpush.msra.mxu1 %v77_v17 }
  0x1c   :  { %157 = vmatpush.msra.mxu2 %v76_v18 }
  0x1d   :  { %103 = vmatpush.msra.mxu1 %v76_v18 }
  0x1e   :  { %158 = vmatpush.msra.mxu2 %v75_v19 }
  0x1f   :  { %104 = vmatpush.msra.mxu1 %v75_v19 }
  0x20   :  { %159 = vmatpush.msra.mxu2 %v74_v21 }
  0x21   :  { %105 = vmatpush.msra.mxu1 %v74_v21 }
  0x74   :  { %v67_v28 = vpop.permute.xlu0 %66 }
  0x75   :  { %vm69_vm1 = vcmp.eq.s32.totalorder %v61_v27, %v67_v28 }
  0x76   :  { %143 = vmatmul.msk.f32.vlgmr.msra.gmra.mxu2 %vm69_vm1, %v165_v29 }
  0x7c   :  { %v64_v30 = vpop.permute.xlu0 %63 }
  0x7d   :  { %vm68_vm2 = vcmp.eq.s32.totalorder %v61_v27, %v64_v30 }
  0x7e   :  { %142 = vmatmul.msk.f32.vlgmr.msra.gmra.mxu1 %vm68_vm2, %v165_v29 }
  0x8d   :  { %v55_v34 = vpop.f32.mrf.mxu0 }
  0x8e   :  { %v56_v35 = vadd.f32 %v163_v31, %v55_v34 }
  0x90   :  { %v115_v36 = vadd.f32 %v113_v32, %v56_v35  ;;  %v130_v37 = vadd.f32 %v128_v33, %v56_v35 }
  0x92   :  { %117 = vst.msk [vmem:[%s303_s6] sm:$0x1] %vm116_vm3, %v115_v36 }
  0x93   :  { %132 = vst.msk [vmem:[%s303_s6 + $0x8] sm:$0x2] %vm131_vm4, %v130_v37 }
  0xf9   :  { %v110_v42 = vpop.f32.mrf.mxu2 }
  0xfa   :  { %v133_v43 = vadd.f32 %v123_v41, %v110_v42 }
  0xfb   :  { %v107_v44 = vpop.f32.mrf.mxu1 }
  0xfc   :  { %134 = vst.msk [vmem:[%s303_s6 + $0xa] sm:$0xff] %vm126_vm6, %v133_v43  ;;  %v125_v45 = vadd.f32 %v123_v41, %v107_v44 }
  0xfe   :  { %127 = vst.msk [vmem:[%s303_s6 + $0x1] sm:$0xff] %vm126_vm6, %v125_v45 }

// kernel: forward.7
= control target key start
LH: loop header
LB: loop body
LE: loop exit
PB: predicated region body
PF: predicated region fallthrough
CT: control target
= control target key end

     0   :  { %vm29_vm0 = vcmask 254976   ;;  %vm22_vm1 = vcmask 261120   ;;  %v277_v6 = vmov 32.0   ;;  %s455_s0 = inlined_call_operand.vmem [shape: f32[18,32], index: 0, kind: input, shape index: {}]   ;;  %s456_s3 = inlined_call_operand.vmem [shape: f32[128,32], index: 3, kind: input, shape index: {}]   ;;  %s457_s1 = inlined_call_operand.vmem [shape: f32[1,32], index: 1, kind: input, shape index: {}]   ;;  %s458_s2 = inlined_call_operand.vmem [shape: f32[1,32], index: 2, kind: input, shape index: {}]   ;;  %s459_s4 = inlined_call_operand.vmem [shape: f32[18,128], index: 4, kind: output, shape index: {}]  }
   0x1   :  { %v19_v0 = vld [vmem:[%s455_s0 + $0x10] sm:$0x3]  ;;  %v18_v1 = vld [vmem:[%s455_s0 + $0x8] sm:$0xff]  ;;  %v17_v4 = vld [vmem:[%s455_s0] sm:$0xff]  ;;  %269 = vrcp.f32 %v277_v6 }
   0x2   :  { %v30_v2 = vsel %vm29_vm0, %v19_v0, 0.0  ;;  %v26_v3 = vsel %vm22_vm1, %v18_v1, 0.0  ;;  %v23_v5 = vsel %vm22_vm1, %v17_v4, 0.0  ;;  %v124_v11 = vld [vmem:[%s456_s3 + $0x78] sm:$0xff]  ;;  %v123_v13 = vld [vmem:[%s456_s3 + $0x70] sm:$0xff]  ;;  %v122_v15 = vld [vmem:[%s456_s3 + $0x68] sm:$0xff] }
   0x3   :  { %31 = vadd.xlane.f32.xlu0 %v30_v2  ;;  %27 = vadd.xlane.f32.xlu1 %v26_v3  ;;  %v121_v18 = vld [vmem:[%s456_s3 + $0x60] sm:$0xff]  ;;  %v120_v22 = vld [vmem:[%s456_s3 + $0x58] sm:$0xff]  ;;  %v119_v27 = vld [vmem:[%s456_s3 + $0x50] sm:$0xff] }
   0x4   :  { %235 = vmatpush.xpose.msk.msra.mxu2 %vm22_vm1, %v124_v11  ;;  %215 = vmatpush.xpose.msk.msra.mxu0 %vm22_vm1, %v124_v11  ;;  %v118_v31 = vld [vmem:[%s456_s3 + $0x48] sm:$0xff]  ;;  %v117_v34 = vld [vmem:[%s456_s3 + $0x40] sm:$0xff]  ;;  %v116_v36 = vld [vmem:[%s456_s3 + $0x38] sm:$0xff] }
   0x5   :  { %234 = vmatpush.xpose.msk.msra.mxu1 %vm22_vm1, %v124_v11  ;;  %v115_v37 = vld [vmem:[%s456_s3 + $0x30] sm:$0xff]  ;;  %v114_v38 = vld [vmem:[%s456_s3 + $0x28] sm:$0xff]  ;;  %v113_v39 = vld [vmem:[%s456_s3 + $0x20] sm:$0xff] }
   0x6   :  { %v112_v40 = vld [vmem:[%s456_s3 + $0x18] sm:$0xff]  ;;  %v111_v41 = vld [vmem:[%s456_s3 + $0x10] sm:$0xff]  ;;  %v110_v42 = vld [vmem:[%s456_s3 + $0x8] sm:$0xff] }
   0x7   :  { %v270_v7 = vpop.eup %269  ;;  %v109_v43 = vld [vmem:[%s456_s3] sm:$0xff] }
   0x8   :  { %v34_v8 = vmul.f32 32.0, %v270_v7  ;;  %vm38_vm2 = vweird.f32 %v270_v7  ;;  %237 = vmatpush.xpose.msk.msra.mxu2 %vm22_vm1, %v123_v13  ;;  %216 = vmatpush.xpose.msk.msra.mxu0 %vm22_vm1, %v123_v13  ;;  %v267_v61 = vld [vmem:[%s457_s1] ss:$0 sm:$0xff] }
   0x9   :  { %236 = vmatpush.xpose.msk.msra.mxu1 %vm22_vm1, %v123_v13 }
   0xa   :  { %v35_v9 = vsub.f32 1.0, %v34_v8 }
   0xb   :  { %24 = vadd.xlane.f32.xlu0 %v23_v5 }
   0xc   :  { %v36_v10 = vmul.f32 %v270_v7, %v35_v9  ;;  %239 = vmatpush.xpose.msk.msra.mxu2 %vm22_vm1, %v122_v15  ;;  %217 = vmatpush.xpose.msk.msra.mxu0 %vm22_vm1, %v122_v15 }
   0xd   :  { %238 = vmatpush.xpose.msk.msra.mxu1 %vm22_vm1, %v122_v15 }
   0xe   :  { %v37_v12 = vadd.f32 %v270_v7, %v36_v10 }
  0x10   :  { %v326_v14 = vsel %vm38_vm2, %v270_v7, %v37_v12  ;;  %241 = vmatpush.xpose.msk.msra.mxu2 %vm22_vm1, %v121_v18  ;;  %218 = vmatpush.xpose.msk.msra.mxu0 %vm22_vm1, %v121_v18 }
  0x11   :  { %240 = vmatpush.xpose.msk.msra.mxu1 %vm22_vm1, %v121_v18 }
  0x14   :  { %243 = vmatpush.xpose.msk.msra.mxu2 %vm22_vm1, %v120_v22  ;;  %219 = vmatpush.xpose.msk.msra.mxu0 %vm22_vm1, %v120_v22 }
  0x15   :  { %242 = vmatpush.xpose.msk.msra.mxu1 %vm22_vm1, %v120_v22 }
  0x18   :  { %245 = vmatpush.xpose.msk.msra.mxu2 %vm22_vm1, %v119_v27  ;;  %220 = vmatpush.xpose.msk.msra.mxu0 %vm22_vm1, %v119_v27 }
  0x19   :  { %244 = vmatpush.xpose.msk.msra.mxu1 %vm22_vm1, %v119_v27 }
  0x1c   :  { %247 = vmatpush.xpose.msk.msra.mxu2 %vm22_vm1, %v118_v31  ;;  %221 = vmatpush.xpose.msk.msra.mxu0 %vm22_vm1, %v118_v31 }
  0x1d   :  { %246 = vmatpush.xpose.msk.msra.mxu1 %vm22_vm1, %v118_v31 }
  0x20   :  { %249 = vmatpush.xpose.msk.msra.mxu2 %vm22_vm1, %v117_v34  ;;  %222 = vmatpush.xpose.msk.msra.mxu0 %vm22_vm1, %v117_v34 }
  0x21   :  { %248 = vmatpush.xpose.msk.msra.mxu1 %vm22_vm1, %v117_v34 }
  0x24   :  { %251 = vmatpush.xpose.msk.msra.mxu2 %vm22_vm1, %v116_v36  ;;  %223 = vmatpush.xpose.msk.msra.mxu0 %vm22_vm1, %v116_v36 }
  0x25   :  { %250 = vmatpush.xpose.msk.msra.mxu1 %vm22_vm1, %v116_v36 }
  0x28   :  { %253 = vmatpush.xpose.msk.msra.mxu2 %vm22_vm1, %v115_v37  ;;  %224 = vmatpush.xpose.msk.msra.mxu0 %vm22_vm1, %v115_v37 }
  0x29   :  { %252 = vmatpush.xpose.msk.msra.mxu1 %vm22_vm1, %v115_v37 }
  0x2c   :  { %255 = vmatpush.xpose.msk.msra.mxu2 %vm22_vm1, %v114_v38  ;;  %225 = vmatpush.xpose.msk.msra.mxu0 %vm22_vm1, %v114_v38 }
  0x2d   :  { %254 = vmatpush.xpose.msk.msra.mxu1 %vm22_vm1, %v114_v38 }
  0x30   :  { %257 = vmatpush.xpose.msk.msra.mxu2 %vm22_vm1, %v113_v39  ;;  %226 = vmatpush.xpose.msk.msra.mxu0 %vm22_vm1, %v113_v39 }
  0x31   :  { %256 = vmatpush.xpose.msk.msra.mxu1 %vm22_vm1, %v113_v39 }
  0x34   :  { %259 = vmatpush.xpose.msk.msra.mxu2 %vm22_vm1, %v112_v40  ;;  %227 = vmatpush.xpose.msk.msra.mxu0 %vm22_vm1, %v112_v40 }
  0x35   :  { %258 = vmatpush.xpose.msk.msra.mxu1 %vm22_vm1, %v112_v40 }
  0x38   :  { %261 = vmatpush.xpose.msk.msra.mxu2 %vm22_vm1, %v111_v41  ;;  %228 = vmatpush.xpose.msk.msra.mxu0 %vm22_vm1, %v111_v41 }
  0x39   :  { %260 = vmatpush.xpose.msk.msra.mxu1 %vm22_vm1, %v111_v41 }
  0x3c   :  { %263 = vmatpush.xpose.msk.msra.mxu2 %vm22_vm1, %v110_v42  ;;  %229 = vmatpush.xpose.msk.msra.mxu0 %vm22_vm1, %v110_v42 }
  0x3d   :  { %262 = vmatpush.xpose.msk.msra.mxu1 %vm22_vm1, %v110_v42 }
  0x40   :  { %265 = vmatpush.xpose.msk.msra.mxu2 %vm22_vm1, %v109_v43  ;;  %230 = vmatpush.xpose.msk.msra.mxu0 %vm22_vm1, %v109_v43 }
  0x41   :  { %264 = vmatpush.xpose.msk.msra.mxu1 %vm22_vm1, %v109_v43 }
  0x76   :  { %v32_v16 = vpop.xlane.xlu0 %31  ;;  %v28_v21 = vpop.xlane.xlu1 %27 }
  0x77   :  { %v42_v17 = vmul.f32 %v326_v14, %v32_v16  ;;  %v41_v26 = vmul.f32 %v326_v14, %v28_v21 }
  0x79   :  { %v339_v19 = vsub.f32 %v19_v0, %v42_v17  ;;  %v360_v29 = vsub.f32 %v18_v1, %v41_v26  ;;  %v268_v1 = vld [vmem:[%s458_s2] ss:$0 sm:$0xff] }
  0x7b   :  { %v48_v20 = vmul.f32 %v339_v19, %v339_v19  ;;  %v47_v33 = vmul.f32 %v360_v29, %v360_v29 }
  0x7d   :  { %v55_v23 = vsel %vm29_vm0, %v48_v20, 0.0  ;;  %v52_v35 = vsel %vm22_vm1, %v47_v33, 0.0 }
  0x7e   :  { %56 = vadd.xlane.f32.xlu1 %v55_v23  ;;  %v25_v24 = vpop.xlane.xlu0 %24 }
  0x7f   :  { %v40_v25 = vmul.f32 %v326_v14, %v25_v24 }
  0x81   :  { %v358_v28 = vsub.f32 %v17_v4, %v40_v25 }
  0x83   :  { %v46_v30 = vmul.f32 %v358_v28, %v358_v28 }
  0x85   :  { %v49_v32 = vsel %vm22_vm1, %v46_v30, 0.0 }
  0x86   :  { %50 = vadd.xlane.f32.xlu2 %v49_v32 }
  0x8e   :  { %53 = vadd.xlane.f32.xlu2 %v52_v35 }
  0xf1   :  { %v57_v44 = vpop.xlane.xlu1 %56 }
  0xf2   :  { %v60_v45 = vmul.f32 %v57_v44, %v326_v14 }
  0xf4   :  { %v63_v46 = vadd.f32 1e-05, %v60_v45 }
  0xf6   :  { %271 = vrsqrt.f32 %v63_v46  ;;  %vm90_vm4 = vweird.f32 %v63_v46 }
  0xf9   :  { %v51_v47 = vpop.xlane.xlu2 %50 }
  0xfa   :  { %v58_v48 = vmul.f32 %v51_v47, %v326_v14 }
  0xfc   :  { %v272_v49 = vpop.eup %271  ;;  %v61_v50 = vadd.f32 1e-05, %v58_v48 }
  0xfd   :  { %v85_v51 = vmul.f32 %v272_v49, %v63_v46  ;;  %vm91_vm3 = vweird.f32 %v272_v49 }
  0xfe   :  { %273 = vrsqrt.f32 %v61_v50  ;;  %vm92_vm5 = vmor %vm90_vm4, %vm91_vm3  ;;  %vm70_vm7 = vweird.f32 %v61_v50 }
  0xff   :  { %v86_v52 = vmul.f32 %v272_v49, %v85_v51 }
 0x101   :  { %v87_v53 = vmul.f32 0.5, %v86_v52  ;;  %v54_v54 = vpop.xlane.xlu2 %53 }
 0x102   :  { %v59_v55 = vmul.f32 %v54_v54, %v326_v14 }
 0x103   :  { %v88_v56 = vsub.f32 1.5, %v87_v53 }
 0x104   :  { %v274_v57 = vpop.eup %273  ;;  %v62_v58 = vadd.f32 1e-05, %v59_v55 }
 0x105   :  { %v89_v59 = vmul.f32 %v272_v49, %v88_v56  ;;  %v65_v60 = vmul.f32 %v274_v57, %v61_v50  ;;  %vm71_vm6 = vweird.f32 %v274_v57 }
 0x106   :  { %275 = vrsqrt.f32 %v62_v58  ;;  %vm72_vm8 = vmor %vm70_vm7, %vm71_vm6  ;;  %vm80_vm10 = vweird.f32 %v62_v58 }
 0x107   :  { %v93_v62 = vsel %vm92_vm5, %v272_v49, %v89_v59  ;;  %v66_v63 = vmul.f32 %v274_v57, %v65_v60 }
 0x108   :  { %v96_v0 = vmul.f32 %v93_v62, %v339_v19 }
 0x109   :  { %v67_v2 = vmul.f32 0.5, %v66_v63 }
 0x10a   :  { %v102_v3 = vmul.f32 %v267_v61, %v96_v0 }
 0x10b   :  { %v68_v4 = vsub.f32 1.5, %v67_v2 }
 0x10c   :  { %v276_v5 = vpop.eup %275  ;;  %v108_v6 = vadd.f32 %v268_v1, %v102_v3 }
 0x10d   :  { %v69_v7 = vmul.f32 %v274_v57, %v68_v4  ;;  %v75_v8 = vmul.f32 %v276_v5, %v62_v58  ;;  %vm81_vm9 = vweird.f32 %v276_v5 }
 0x10e   :  { %233 = vmatmul.msk.f32.vlgmr.msra.gmra.mxu2 %vm22_vm1, %v108_v6  ;;  %vm82_vm11 = vmor %vm80_vm10, %vm81_vm9 }
 0x10f   :  { %v73_v9 = vsel %vm72_vm8, %v274_v57, %v69_v7  ;;  %v76_v10 = vmul.f32 %v276_v5, %v75_v8 }
 0x110   :  { %v94_v11 = vmul.f32 %v73_v9, %v358_v28 }
 0x111   :  { %v77_v12 = vmul.f32 0.5, %v76_v10 }
 0x112   :  { %v100_v13 = vmul.f32 %v267_v61, %v94_v11 }
 0x113   :  { %v78_v14 = vsub.f32 1.5, %v77_v12 }
 0x114   :  { %v106_v15 = vadd.f32 %v268_v1, %v100_v13 }
 0x115   :  { %v79_v16 = vmul.f32 %v276_v5, %v78_v14 }
 0x116   :  { %231 = vmatmul.msk.f32.vlgmr.msra.gmra.mxu0 %vm22_vm1, %v106_v15 }
 0x117   :  { %v83_v17 = vsel %vm82_vm11, %v276_v5, %v79_v16 }
 0x118   :  { %v95_v18 = vmul.f32 %v83_v17, %v360_v29 }
 0x11a   :  { %v101_v19 = vmul.f32 %v267_v61, %v95_v18 }
 0x11c   :  { %v107_v20 = vadd.f32 %v268_v1, %v101_v19 }
 0x11e   :  { %232 = vmatmul.msk.f32.vlgmr.msra.gmra.mxu1 %vm22_vm1, %v107_v20 }
 0x191   :  { %v205_v21 = vpop.f32.mrf.mxu2 }
 0x192   :  { %210 = vst [vmem:[%s459_s4 + $0x10] sm:$0x3] %v205_v21 }
 0x193   :  { %v199_v22 = vpop.f32.mrf.mxu0 }
 0x194   :  { %208 = vst [vmem:[%s459_s4] sm:$0xff] %v199_v22 }
 0x19b   :  { %v202_v23 = vpop.f32.mrf.mxu1 }
 0x19c   :  { %209 = vst [vmem:[%s459_s4 + $0x8] sm:$0xff] %v202_v23 }

// kernel: forward.5
= control target key start
LH: loop header
LB: loop body
LE: loop exit
PB: predicated region body
PF: predicated region fallthrough
CT: control target
= control target key end

     0   :  { %vm79_vm0 = vcmask 261120   ;;  %vm86_vm1 = vcmask 254976   ;;  %v2079_v6 = vmov 32.0   ;;  %s2080_s26 = smov 96   ;;  %s2081_s30 = smov 64   ;;  %vm295_vm12 = vcmask 64512   ;;  %s2767_s0 = inlined_call_operand.vmem [shape: f32[18,32], index: 0, kind: input, shape index: {}]   ;;  %s2768_s5 = inlined_call_operand.vmem [shape: f32[1,96], index: 5, kind: input, shape index: {}]   ;;  %s2769_s2 = inlined_call_operand.vmem [shape: f32[1,32], index: 2, kind: input, shape index: {}]   ;;  %s2770_s3 = inlined_call_operand.vmem [shape: f32[1,32], index: 3, kind: input, shape index: {}]   ;;  %s2771_s4 = inlined_call_operand.vmem [shape: f32[32,96], index: 4, kind: input, shape index: {}]   ;;  %s2772_s1 = inlined_call_operand.vmem [shape: f32[18,18], index: 1, kind: input, shape index: {}]   ;;  %s2773_s6 = inlined_call_operand.vmem [shape: f32[32,32], index: 6, kind: input, shape index: {}]   ;;  %s2774_s7 = inlined_call_operand.vmem [shape: f32[1,32], index: 7, kind: input, shape index: {}]   ;;  %s2775_s8 = inlined_call_operand.vmem [shape: f32[32,16], index: 8, kind: input, shape index: {}]   ;;  %s2776_s9 = inlined_call_operand.vmem [shape: f32[1,16], index: 9, kind: input, shape index: {}]   ;;  %s2777_s11 = inlined_call_operand.vmem [shape: f32[1,32], index: 11, kind: input, shape index: {}]   ;;  %s2778_s10 = inlined_call_operand.vmem [shape: f32[16,32], index: 10, kind: input, shape index: {}]   ;;  %s2779_s12 = inlined_call_operand.vmem [shape: f32[1,32], index: 12, kind: input, shape index: {}]   ;;  %s2780_s13 = inlined_call_operand.vmem [shape: f32[1,32], index: 13, kind: input, shape index: {}]   ;;  %s2781_s15 = inlined_call_operand.vmem [shape: f32[1,128], index: 15, kind: input, shape index: {}]   ;;  %s2782_s14 = inlined_call_operand.vmem [shape: f32[32,128], index: 14, kind: input, shape index: {}]   ;;  %s2783_s16 = inlined_call_operand.vmem [shape: f32[128,32], index: 16, kind: input, shape index: {}]   ;;  %s2784_s17 = inlined_call_operand.vmem [shape: f32[1,32], index: 17, kind: input, shape index: {}]   ;;  %s2785_s18 = inlined_call_operand.vmem [shape: f32[32,16], index: 18, kind: input, shape index: {}]   ;;  %s2786_s19 = inlined_call_operand.vmem [shape: f32[1,16], index: 19, kind: input, shape index: {}]   ;;  %s2787_s21 = inlined_call_operand.vmem [shape: f32[1,32], index: 21, kind: input, shape index: {}]   ;;  %s2788_s20 = inlined_call_operand.vmem [shape: f32[16,32], index: 20, kind: input, shape index: {}]   ;;  %s2789_s22 = inlined_call_operand.vmem [shape: f32[18,32], index: 22, kind: output, shape index: {}]  }
   0x1   :  { %2794 = sst [smem:[#allocation2_spill]] %s2767_s0  ;;  %1992 = vrcp.f32 %v2079_v6  ;;  %vm346_vm13 = vcmask 146432   ;;  %vm353_vm14 = vcmask 140288   ;;  %vm390_vm15 = vcmask 1041408   ;;  %s2085_s27 = smov 112  }
   0x2   :  { %2795 = sst [smem:[#allocation3_spill]] %s2768_s5  ;;  %s2083_s5 = smov 120  }
   0x3   :  { %2796 = sst [smem:[#allocation4_spill]] %s2769_s2  ;;  %s2084_s2 = smov 56  }
   0x4   :  { %2797 = sst [smem:[#allocation5_spill]] %s2770_s3  ;;  %s2087_s28 = smov 48  }
   0x5   :  { %2798 = sst [smem:[#allocation6_spill]] %s2771_s4  ;;  %s2082_s4 = smov 88  }
   0x6   :  { %2799 = sst [smem:[#allocation7_spill]] %s2772_s1 }
   0x7   :  { %2800 = sst [smem:[#allocation8_spill]] %s2773_s6  ;;  %v1993_v7 = vpop.eup %1992  ;;  %s2089_s6 = smov 104  }
   0x8   :  { %s2801_s29 = sld [smem:[#allocation2_spill]]  ;;  %v91_v8 = vmul.f32 32.0, %v1993_v7  ;;  %vm95_vm2 = vweird.f32 %v1993_v7 }
   0x9   :  { %s2802_s24 = sld [smem:[#allocation6_spill]] }
   0xa   :  { %v92_v9 = vsub.f32 1.0, %v91_v8  ;;  %s2803_s23 = sld [smem:[#allocation3_spill]] }
   0xb   :  { %s2805_s3 = sld [smem:[#allocation5_spill]] }
   0xc   :  { %v93_v10 = vmul.f32 %v1993_v7, %v92_v9  ;;  %s2806_s1 = sld [smem:[#allocation7_spill]] }
   0xe   :  { %v72_v0 = vld [vmem:[%s2801_s29 + $0x8] sm:$0xff]  ;;  %v73_v1 = vld [vmem:[%s2801_s29 + $0x10] sm:$0x3]  ;;  %v71_v4 = vld [vmem:[%s2801_s29] sm:$0xff]  ;;  %v94_v14 = vadd.f32 %v1993_v7, %v93_v10 }
   0xf   :  { %v83_v2 = vsel %vm79_vm0, %v72_v0, 0.0  ;;  %v87_v3 = vsel %vm86_vm1, %v73_v1, 0.0  ;;  %v80_v5 = vsel %vm79_vm0, %v71_v4, 0.0  ;;  %v168_v11 = vld [vmem:[%s2802_s24 + $0x10] sm:$0xff]  ;;  %v169_v12 = vld [vmem:[%s2802_s24 + $0x18] sm:$0xff]  ;;  %v167_v15 = vld [vmem:[%s2802_s24 + $0x8] sm:$0xff] }
  0x10   :  { %84 = vadd.xlane.f32.xlu0 %v83_v2  ;;  %88 = vadd.xlane.f32.xlu1 %v87_v3  ;;  %v2224_v13 = vpack.i.bf16 %v168_v11, %v169_v12  ;;  %v2231_v16 = vsel %vm95_vm2, %v1993_v7, %v94_v14  ;;  %v166_v17 = vld [vmem:[%s2802_s24] sm:$0xff]  ;;  %vm1385_vm2 = vcmask 130048  }
  0x11   :  { %195 = vmatpush.msra.mxu0 %v169_v12  ;;  %1850 = vmatpush.msra.mxu2 %v169_v12  ;;  %v2256_v33 = vpack.i.bf16 %v166_v17, %v167_v15  ;;  %v2267_v34 = vld [vmem:[%s2803_s23] ss:$0 sm:$0xff]  ;;  %s2088_s23 = smov 72  }
  0x12   :  { %v1982_v61 = vld [vmem:[%s2805_s3] ss:$0 sm:$0xff]  ;;  %s2086_s3 = smov 80  }
  0x13   :  { %196 = vmatpush.msra.mxu0 %v168_v11  ;;  %1851 = vmatpush.msra.mxu2 %v168_v11 }
  0x15   :  { %197 = vmatpush.msra.mxu0 %v167_v15  ;;  %1852 = vmatpush.msra.mxu2 %v167_v15 }
  0x17   :  { %198 = vmatpush.msra.mxu0 %v166_v17  ;;  %1853 = vmatpush.msra.mxu2 %v166_v17 }
  0x18   :  { %81 = vadd.xlane.f32.xlu0 %v80_v5 }
  0x2c   :  { %1871 = vrot.lane.b32.xlu0 %v2224_v13, %s2080_s26 }
  0x34   :  { %1881 = vrot.lane.b32.xlu0 %v2224_v13, %s2081_s30 }
  0x3c   :  { %1896 = vrot.lane.b32.xlu0 %v2256_v33, %s2082_s4 }
  0x83   :  { %v85_v18 = vpop.xlane.xlu0 %84  ;;  %v89_v22 = vpop.xlane.xlu1 %88 }
  0x84   :  { %v98_v19 = vmul.f32 %v2231_v16, %v85_v18  ;;  %v99_v26 = vmul.f32 %v2231_v16, %v89_v22 }
  0x86   :  { %v2237_v20 = vsub.f32 %v72_v0, %v98_v19  ;;  %v2248_v28 = vsub.f32 %v73_v1, %v99_v26 }
  0x88   :  { %v104_v21 = vmul.f32 %v2237_v20, %v2237_v20  ;;  %v105_v31 = vmul.f32 %v2248_v28, %v2248_v28 }
  0x8a   :  { %v109_v23 = vsel %vm79_vm0, %v104_v21, 0.0  ;;  %v112_v32 = vsel %vm86_vm1, %v105_v31, 0.0 }
  0x8b   :  { %110 = vadd.xlane.f32.xlu1 %v109_v23  ;;  %v82_v24 = vpop.xlane.xlu0 %81 }
  0x8c   :  { %v97_v25 = vmul.f32 %v2231_v16, %v82_v24 }
  0x8e   :  { %v2244_v27 = vsub.f32 %v71_v4, %v97_v25 }
  0x90   :  { %v103_v29 = vmul.f32 %v2244_v27, %v2244_v27 }
  0x92   :  { %v106_v30 = vsel %vm79_vm0, %v103_v29, 0.0 }
  0x93   :  { %107 = vadd.xlane.f32.xlu2 %v106_v30 }
  0x9b   :  { %113 = vadd.xlane.f32.xlu2 %v112_v32 }
  0x9e   :  { %v1872_v35 = vpop.permute.xlu0 %1871 }
  0x9f   :  { %v1873_v36 = vunpack.i.l.bf16 %v1872_v35  ;;  %v1874_v37 = vunpack.i.h.bf16 %v1872_v35 }
  0xa1   :  { %1854 = vmatpush.msra.mxu1 %v1873_v36  ;;  %240 = vmatpush.msrb.mxu0 %v1873_v36 }
  0xa3   :  { %1855 = vmatpush.msra.mxu1 %v1874_v37  ;;  %241 = vmatpush.msrb.mxu0 %v1874_v37 }
  0xa4   :  { %1876 = vrot.lane.b32.xlu1 %v2256_v33, %s2080_s26 }
  0xa6   :  { %v1882_v45 = vpop.permute.xlu0 %1881 }
  0xa7   :  { %v1883_v47 = vunpack.i.l.bf16 %v1882_v45  ;;  %v1884_v49 = vunpack.i.h.bf16 %v1882_v45 }
  0xa9   :  { %281 = vmatpush.msrb.mxu2 %v1883_v47 }
  0xab   :  { %282 = vmatpush.msrb.mxu2 %v1884_v49 }
  0xac   :  { %1891 = vrot.lane.b32.xlu1 %v2224_v13, %s2082_s4 }
  0xb3   :  { %225 = vrot.lane.b32.xlu2 %v2267_v34, %s2080_s26  ;;  %s2804_s26 = sld [smem:[#allocation4_spill]] }
  0xb4   :  { %1906 = vrot.lane.b32.xlu1 %v2256_v33, %s2083_s5 }
  0xb9   :  { %v1981_v58 = vld [vmem:[%s2804_s26] ss:$0 sm:$0xff] }
  0xbb   :  { %1886 = vrot.lane.b32.xlu2 %v2256_v33, %s2081_s30 }
  0xc3   :  { %1901 = vrot.lane.b32.xlu2 %v2224_v13, %s2083_s5 }
  0xfe   :  { %v111_v38 = vpop.xlane.xlu1 %110 }
  0xff   :  { %v116_v39 = vmul.f32 %v111_v38, %v2231_v16 }
 0x101   :  { %v119_v40 = vadd.f32 1e-05, %v116_v39 }
 0x103   :  { %1994 = vrsqrt.f32 %v119_v40  ;;  %vm137_vm4 = vweird.f32 %v119_v40 }
 0x106   :  { %v108_v41 = vpop.xlane.xlu2 %107 }
 0x107   :  { %v115_v42 = vmul.f32 %v108_v41, %v2231_v16 }
 0x109   :  { %v1995_v43 = vpop.eup %1994  ;;  %v118_v44 = vadd.f32 1e-05, %v115_v42 }
 0x10a   :  { %v132_v46 = vmul.f32 %v1995_v43, %v119_v40  ;;  %vm138_vm3 = vweird.f32 %v1995_v43 }
 0x10b   :  { %1996 = vrsqrt.f32 %v118_v44  ;;  %vm139_vm5 = vmor %vm137_vm4, %vm138_vm3  ;;  %vm127_vm7 = vweird.f32 %v118_v44 }
 0x10c   :  { %v133_v48 = vmul.f32 %v1995_v43, %v132_v46 }
 0x10e   :  { %v134_v50 = vmul.f32 0.5, %v133_v48  ;;  %v114_v51 = vpop.xlane.xlu2 %113 }
 0x10f   :  { %v117_v52 = vmul.f32 %v114_v51, %v2231_v16 }
 0x110   :  { %v135_v53 = vsub.f32 1.5, %v134_v50 }
 0x111   :  { %v1997_v54 = vpop.eup %1996  ;;  %v120_v55 = vadd.f32 1e-05, %v117_v52 }
 0x112   :  { %v136_v56 = vmul.f32 %v1995_v43, %v135_v53  ;;  %v122_v57 = vmul.f32 %v1997_v54, %v118_v44  ;;  %vm128_vm6 = vweird.f32 %v1997_v54 }
 0x113   :  { %1998 = vrsqrt.f32 %v120_v55  ;;  %vm129_vm8 = vmor %vm127_vm7, %vm128_vm6  ;;  %vm147_vm10 = vweird.f32 %v120_v55 }
 0x114   :  { %v140_v59 = vsel %vm139_vm5, %v1995_v43, %v136_v56  ;;  %v123_v60 = vmul.f32 %v1997_v54, %v122_v57 }
 0x115   :  { %v152_v62 = vmul.f32 %v140_v59, %v2237_v20  ;;  %v2349_v59 = vld [vmem:[%s2806_s1 + $0x8] sm:$0xff] }
 0x116   :  { %v124_v63 = vmul.f32 0.5, %v123_v60  ;;  %v1877_v0 = vpop.permute.xlu1 %1876  ;;  %v2287_v1 = vpop.permute.xlu2 %225 }
 0x117   :  { %v158_v2 = vmul.f32 %v1981_v58, %v152_v62  ;;  %v1878_v3 = vunpack.i.l.bf16 %v1877_v0  ;;  %v1879_v4 = vunpack.i.h.bf16 %v1877_v0  ;;  %v2356_v0 = vld [vmem:[%s2806_s1 + $0x10] sm:$0x3] }
 0x118   :  { %v125_v5 = vsub.f32 1.5, %v124_v63 }
 0x119   :  { %v1999_v6 = vpop.eup %1998  ;;  %v2289_v7 = vadd.f32 %v1982_v61, %v158_v2  ;;  %1856 = vmatpush.msra.mxu1 %v1878_v3  ;;  %242 = vmatpush.msrb.mxu0 %v1878_v3 }
 0x11a   :  { %v126_v8 = vmul.f32 %v1997_v54, %v125_v5  ;;  %v142_v9 = vmul.f32 %v1999_v6, %v120_v55  ;;  %vm148_vm9 = vweird.f32 %v1999_v6 }
 0x11b   :  { %1748 = vmatmul.msk.f32.vlgmr.msra.gmra.mxu2 %vm79_vm0, %v2289_v7  ;;  %1857 = vmatpush.msra.mxu1 %v1879_v4  ;;  %vm149_vm11 = vmor %vm147_vm10, %vm148_vm9 }
 0x11c   :  { %v130_v10 = vsel %vm129_vm8, %v1997_v54, %v126_v8  ;;  %v143_v11 = vmul.f32 %v1999_v6, %v142_v9  ;;  %1751 = vmatmul.msk.f32.vlgmr.msra.gmra.mxu1 %vm79_vm0, %v2289_v7  ;;  %243 = vmatpush.msrb.mxu0 %v1879_v4  ;;  %v2342_v54 = vld [vmem:[%s2806_s1] sm:$0xff] }
 0x11d   :  { %v151_v12 = vmul.f32 %v130_v10, %v2244_v27  ;;  %v1897_v27 = vpop.permute.xlu0 %1896 }
 0x11e   :  { %v144_v14 = vmul.f32 0.5, %v143_v11  ;;  %v1887_v15 = vpop.permute.xlu2 %1886  ;;  %v1892_v17 = vpop.permute.xlu1 %1891  ;;  %v1898_v30 = vunpack.i.l.bf16 %v1897_v27  ;;  %v1899_v32 = vunpack.i.h.bf16 %v1897_v27 }
 0x11f   :  { %v157_v18 = vmul.f32 %v1981_v58, %v151_v12  ;;  %v1888_v19 = vunpack.i.l.bf16 %v1887_v15  ;;  %v1893_v21 = vunpack.i.l.bf16 %v1892_v17  ;;  %v1889_v22 = vunpack.i.h.bf16 %v1887_v15 }
 0x120   :  { %v145_v20 = vsub.f32 1.5, %v144_v14  ;;  %v1894_v25 = vunpack.i.h.bf16 %v1892_v17 }
 0x121   :  { %v2296_v23 = vadd.f32 %v1982_v61, %v157_v18  ;;  %283 = vmatpush.msrb.mxu2 %v1888_v19 }
 0x122   :  { %v146_v24 = vmul.f32 %v1999_v6, %v145_v20 }
 0x123   :  { %1747 = vmatmul.msk.f32.vlgmr.msra.gmra.mxu0 %vm79_vm0, %v2296_v23  ;;  %284 = vmatpush.msrb.mxu2 %v1889_v22 }
 0x124   :  { %v150_v26 = vsel %vm149_vm11, %v1999_v6, %v146_v24 }
 0x125   :  { %489 = vmatpush.msra.mxu2 %v1893_v21  ;;  %v153_v29 = vmul.f32 %v150_v26, %v2248_v28 }
 0x126   :  { %v1902_v31 = vpop.permute.xlu2 %1901  ;;  %v1907_v37 = vpop.permute.xlu1 %1906 }
 0x127   :  { %490 = vmatpush.msra.mxu2 %v1894_v25  ;;  %v159_v35 = vmul.f32 %v1981_v58, %v153_v29  ;;  %v1903_v36 = vunpack.i.l.bf16 %v1902_v31  ;;  %v1904_v39 = vunpack.i.h.bf16 %v1902_v31  ;;  %v1908_v28 = vunpack.i.l.bf16 %v1907_v37 }
 0x128   :  { %v1909_v40 = vunpack.i.h.bf16 %v1907_v37 }
 0x129   :  { %491 = vmatpush.msra.mxu2 %v1898_v30  ;;  %v2301_v38 = vadd.f32 %v1982_v61, %v159_v35  ;;  %448 = vmatpush.msrb.mxu1 %v1903_v36 }
 0x12b   :  { %492 = vmatpush.msra.mxu2 %v1899_v32  ;;  %1750 = vmatmul.msk.f32.vlgmr.msrb.gmra.mxu0 %vm79_vm0, %v2296_v23 }
 0x12c   :  { %1749 = vmatmul.msk.f32.gmra.mxu2 %vm79_vm0, %v2301_v38  ;;  %1752 = vmatmul.msk.f32.gmra.mxu1 %vm79_vm0, %v2301_v38 }
 0x12d   :  { %449 = vmatpush.msrb.mxu1 %v1904_v39 }
 0x12f   :  { %450 = vmatpush.msrb.mxu1 %v1908_v28 }
 0x131   :  { %451 = vmatpush.msrb.mxu1 %v1909_v40 }
 0x134   :  { %1753 = vmatmul.msk.f32.vlgmr.msrb.gmra.mxu2 %vm79_vm0, %v2296_v23  ;;  %1766 = vmatmul.msk.f32.vlgmr.msrb.gmra.mxu1 %vm79_vm0, %v2296_v23 }
 0x13c   :  { %1754 = vmatmul.msk.f32.gmra.mxu2 %vm79_vm0, %v2289_v7  ;;  %1767 = vmatmul.msk.f32.gmra.mxu1 %vm79_vm0, %v2289_v7 }
 0x144   :  { %1755 = vmatmul.msk.f32.gmra.mxu2 %vm79_vm0, %v2301_v38  ;;  %1768 = vmatmul.msk.f32.gmra.mxu1 %vm79_vm0, %v2301_v38 }
 0x14c   :  { %1769 = vmatmul.msk.f32.vlgmr.msra.gmra.mxu2 %vm79_vm0, %v2296_v23 }
 0x154   :  { %1770 = vmatmul.msk.f32.gmra.mxu2 %vm79_vm0, %v2289_v7 }
 0x15c   :  { %1771 = vmatmul.msk.f32.gmra.mxu2 %vm79_vm0, %v2301_v38 }
 0x199   :  { %v248_v41 = vpop.f32.mrf.mxu1 }
 0x19a   :  { %v249_v45 = vadd.f32 %v248_v41, %v2287_v1 }
 0x19e   :  { %v203_v49 = vpop.f32.mrf.mxu2 }
 0x19f   :  { %v204_v50 = vadd.f32 %v2267_v34, %v203_v49 }
 0x1a0   :  { %v200_v42 = vpop.f32.mrf.mxu0 }
 0x1a1   :  { %v201_v48 = vadd.f32 %v2267_v34, %v200_v42 }
 0x1a8   :  { %v245_v46 = vpop.f32.mrf.mxu0 }
 0x1a9   :  { %v251_v43 = vpop.f32.mrf.mxu1  ;;  %v246_v47 = vadd.f32 %v245_v46, %v2287_v1 }
 0x1aa   :  { %v252_v44 = vadd.f32 %v251_v43, %v2287_v1 }
 0x1ac   :  { %1756 = vmatpush.xpose.msk.msra.mxu3 %vm295_vm12, %v252_v44 }
 0x1af   :  { %v206_v51 = vpop.f32.mrf.mxu2 }
 0x1b0   :  { %1757 = vmatpush.xpose.msk.msra.mxu3 %vm295_vm12, %v249_v45  ;;  %v207_v52 = vadd.f32 %v2267_v34, %v206_v51 }
 0x1b4   :  { %1758 = vmatpush.xpose.msk.msra.mxu3 %vm295_vm12, %v246_v47 }
 0x1b7   :  { %1759 = vmatmul.msk.f32.vlgmr.msra.gmra.mxu3 %vm295_vm12, %v201_v48  ;;  %v286_v4 = vpop.f32.mrf.mxu2 }
 0x1bf   :  { %1760 = vmatmul.msk.f32.gmra.mxu3 %vm295_vm12, %v204_v50  ;;  %v289_v9 = vpop.f32.mrf.mxu2 }
 0x1c7   :  { %1761 = vmatmul.msk.f32.gmra.mxu3 %vm295_vm12, %v207_v52  ;;  %v292_v17 = vpop.f32.mrf.mxu2 }
 0x1cf   :  { %v494_v43 = vpop.f32.mrf.mxu2 }
 0x1d7   :  { %v497_v47 = vpop.f32.mrf.mxu2 }
 0x1df   :  { %v500_v50 = vpop.f32.mrf.mxu2 }
 0x23a   :  { %v331_v53 = vpop.f32.mrf.mxu3 }
 0x23b   :  { %v340_v55 = vmul.f32 0.35355338, %v331_v53 }
 0x23d   :  { %v343_v56 = vadd.f32 %v340_v55, %v2342_v54  ;;  %v453_v55 = vpop.f32.mrf.mxu1 }
 0x23f   :  { %v347_v57 = vsel %vm346_vm13, %v343_v56, -inf }
 0x240   :  { %348 = vmax.xlane.f32.xlu0 %v347_v57 }
 0x242   :  { %v334_v58 = vpop.f32.mrf.mxu3 }
 0x243   :  { %v341_v60 = vmul.f32 0.35355338, %v334_v58 }
 0x245   :  { %v344_v61 = vadd.f32 %v341_v60, %v2349_v59  ;;  %v456_v60 = vpop.f32.mrf.mxu1 }
 0x247   :  { %v350_v62 = vsel %vm346_vm13, %v344_v61, -inf }
 0x248   :  { %351 = vmax.xlane.f32.xlu2 %v350_v62 }
 0x24a   :  { %v337_v63 = vpop.f32.mrf.mxu3 }
 0x24b   :  { %v342_v1 = vmul.f32 0.35355338, %v337_v63 }
 0x24d   :  { %v345_v2 = vadd.f32 %v342_v1, %v2356_v0  ;;  %v459_v62 = vpop.f32.mrf.mxu1 }
 0x24f   :  { %v354_v3 = vsel %vm353_vm14, %v345_v2, -inf }
 0x250   :  { %355 = vmax.xlane.f32.xlu1 %v354_v3 }
 0x260   :  { %266 = vrot.lane.b32.xlu2 %v2267_v34, %s2081_s30 }
 0x268   :  { %1911 = vrot.lane.b32.xlu2 %v2224_v13, %s2084_s2 }
 0x270   :  { %1916 = vrot.lane.b32.xlu2 %v2256_v33, %s2084_s2 }
 0x2b3   :  { %v349_v5 = vpop.xlane.xlu0 %348 }
 0x2b4   :  { %v357_v6 = vsub.f32 %v343_v56, %v349_v5 }
 0x2b6   :  { %v360_v8 = vmul.f32 1.442695, %v357_v6 }
 0x2b8   :  { %2000 = vpow2.f32 %v360_v8 }
 0x2bb   :  { %v352_v10 = vpop.xlane.xlu2 %351 }
 0x2bc   :  { %v358_v11 = vsub.f32 %v344_v61, %v352_v10 }
 0x2be   :  { %v2001_v12 = vpop.eup %2000  ;;  %v362_v14 = vmul.f32 1.442695, %v358_v11 }
 0x2bf   :  { %v366_v15 = vsel %vm346_vm13, %v2001_v12, 0.0 }
 0x2c0   :  { %2002 = vpow2.f32 %v362_v14  ;;  %367 = vadd.xlane.f32.xlu0 %v366_v15 }
 0x2c3   :  { %v267_v18 = vpop.permute.xlu2 %266  ;;  %v356_v19 = vpop.xlane.xlu1 %355 }
 0x2c4   :  { %v293_v20 = vadd.f32 %v292_v17, %v267_v18  ;;  %v359_v21 = vsub.f32 %v345_v2, %v356_v19  ;;  %v290_v24 = vadd.f32 %v289_v9, %v267_v18  ;;  %v287_v27 = vadd.f32 %v286_v4, %v267_v18 }
 0x2c6   :  { %v2003_v22 = vpop.eup %2002  ;;  %v364_v25 = vmul.f32 1.442695, %v359_v21  ;;  %1762 = vmatpush.msk.msra.mxu0 %vm390_vm15, %v293_v20 }
 0x2c7   :  { %v369_v26 = vsel %vm346_vm13, %v2003_v22, 0.0 }
 0x2c8   :  { %2004 = vpow2.f32 %v364_v25  ;;  %408 = vmatpush.msra.mxu0 %v290_v24  ;;  %370 = vadd.xlane.f32.xlu1 %v369_v26 }
 0x2ca   :  { %409 = vmatpush.msra.mxu0 %v287_v27 }
 0x2cb   :  { %v1912_v29 = vpop.permute.xlu2 %1911 }
 0x2cc   :  { %v1913_v30 = vunpack.i.l.bf16 %v1912_v29  ;;  %v1914_v31 = vunpack.i.h.bf16 %v1912_v29 }
 0x2ce   :  { %v2005_v32 = vpop.eup %2004  ;;  %530 = vmatpush.msrb.mxu3 %v1913_v30 }
 0x2cf   :  { %v372_v35 = vsel %vm353_vm14, %v2005_v32, 0.0 }
 0x2d0   :  { %373 = vadd.xlane.f32.xlu0 %v372_v35  ;;  %531 = vmatpush.msrb.mxu3 %v1914_v31 }
 0x2d3   :  { %v1917_v36 = vpop.permute.xlu2 %1916 }
 0x2d4   :  { %v1918_v37 = vunpack.i.l.bf16 %v1917_v36  ;;  %v1919_v39 = vunpack.i.h.bf16 %v1917_v36 }
 0x2d6   :  { %532 = vmatpush.msrb.mxu3 %v1918_v37 }
 0x2d8   :  { %533 = vmatpush.msrb.mxu3 %v1919_v39 }
 0x2d9   :  { %1772 = vmatmul.msk.f32.vlgmr.msrb.gmra.mxu3 %vm79_vm0, %v2296_v23 }
 0x2e1   :  { %1773 = vmatmul.msk.f32.gmra.mxu3 %vm79_vm0, %v2289_v7  ;;  %474 = vrot.lane.b32.xlu1 %v2267_v34, %s2082_s4  ;;  %s2090_s4 = smov 40  }
 0x2e4   :  { %433 = vrot.lane.b32.xlu0 %v2267_v34, %s2083_s5  ;;  %s2807_s5 = sld [smem:[#allocation8_spill]] }
 0x2e9   :  { %1774 = vmatmul.msk.f32.gmra.mxu3 %vm79_vm0, %v2301_v38 }
 0x2ea   :  { %v420_v1 = vld [vmem:[%s2807_s5] sm:$0xff] }
 0x2eb   :  { %725 = vmatpush.msra.mxu3 %v420_v1 }
 0x333   :  { %v368_v28 = vpop.xlane.xlu0 %367 }
 0x334   :  { %2006 = vrcp.f32 %v368_v28 }
 0x33a   :  { %v2007_v40 = vpop.eup %2006 }
 0x33b   :  { %v378_v41 = vmul.f32 %v2007_v40, %v2001_v12  ;;  %v371_v42 = vpop.xlane.xlu1 %370 }
 0x33c   :  { %2008 = vrcp.f32 %v371_v42 }
 0x33d   :  { %1763 = vmatmul.msk.f32.vlgmr.msra.gmra.mxu0 %vm346_vm13, %v378_v41 }
 0x342   :  { %v2009_v44 = vpop.eup %2008 }
 0x343   :  { %v374_v45 = vpop.xlane.xlu0 %373  ;;  %v379_v46 = vmul.f32 %v2009_v44, %v2003_v22 }
 0x344   :  { %2010 = vrcp.f32 %v374_v45 }
 0x345   :  { %1764 = vmatmul.msk.f32.gmra.mxu0 %vm346_vm13, %v379_v46 }
 0x34a   :  { %v2011_v48 = vpop.eup %2010 }
 0x34b   :  { %v380_v49 = vmul.f32 %v2011_v48, %v2005_v32 }
 0x34d   :  { %1765 = vmatmul.msk.f32.gmra.mxu0 %vm346_vm13, %v380_v49 }
 0x353   :  { %v475_v51 = vpop.permute.xlu1 %474 }
 0x354   :  { %v501_v52 = vadd.f32 %v500_v50, %v475_v51  ;;  %v498_v53 = vadd.f32 %v497_v47, %v475_v51  ;;  %v495_v56 = vadd.f32 %v494_v43, %v475_v51 }
 0x356   :  { %1775 = vmatpush.xpose.msk.msrb.mxu0 %vm295_vm12, %v501_v52  ;;  %v434_v57 = vpop.permute.xlu0 %433 }
 0x357   :  { %v454_v58 = vadd.f32 %v453_v55, %v434_v57  ;;  %v457_v61 = vadd.f32 %v456_v60, %v434_v57  ;;  %v460_v63 = vadd.f32 %v459_v62, %v434_v57 }
 0x35a   :  { %1776 = vmatpush.xpose.msk.msrb.mxu0 %vm295_vm12, %v498_v53 }
 0x35c   :  { %v535_v29 = vpop.f32.mrf.mxu3 }
 0x35e   :  { %1777 = vmatpush.xpose.msk.msrb.mxu0 %vm295_vm12, %v495_v56 }
 0x361   :  { %1778 = vmatmul.msk.f32.vlgmr.msrb.gmra.mxu0 %vm295_vm12, %v454_v58 }
 0x364   :  { %v538_v39 = vpop.f32.mrf.mxu3 }
 0x369   :  { %1779 = vmatmul.msk.f32.gmra.mxu0 %vm295_vm12, %v457_v61 }
 0x36c   :  { %v541_v41 = vpop.f32.mrf.mxu3 }
 0x371   :  { %1780 = vmatmul.msk.f32.gmra.mxu0 %vm295_vm12, %v460_v63 }
 0x3ba   :  { %v411_v2 = vpop.f32.mrf.mxu0 }
 0x3bb   :  { %1788 = vmatmul.msk.f32.vlgmr.msra.gmra.mxu3 %vm295_vm12, %v411_v2 }
 0x3c2   :  { %v414_v3 = vpop.f32.mrf.mxu0 }
 0x3c3   :  { %1789 = vmatmul.msk.f32.gmra.mxu3 %vm295_vm12, %v414_v3 }
 0x3ca   :  { %v417_v4 = vpop.f32.mrf.mxu0 }
 0x3cb   :  { %1790 = vmatmul.msk.f32.gmra.mxu3 %vm295_vm12, %v417_v4 }
 0x3de   :  { %v579_v5 = vpop.f32.mrf.mxu0 }
 0x3df   :  { %v588_v6 = vmul.f32 0.35355338, %v579_v5 }
 0x3e1   :  { %v591_v8 = vadd.f32 %v588_v6, %v2342_v54  ;;  %v665_v6 = vld [vmem:[%s2807_s5 + $0x8] sm:$0xff] }
 0x3e2   :  { %690 = vmatpush.msrb.mxu2 %v665_v6 }
 0x3e3   :  { %v594_v9 = vsel %vm346_vm13, %v591_v8, -inf }
 0x3e4   :  { %595 = vmax.xlane.f32.xlu0 %v594_v9 }
 0x3e6   :  { %v582_v10 = vpop.f32.mrf.mxu0 }
 0x3e7   :  { %v589_v11 = vmul.f32 0.35355338, %v582_v10 }
 0x3e9   :  { %v592_v12 = vadd.f32 %v589_v11, %v2349_v59 }
 0x3eb   :  { %v597_v14 = vsel %vm346_vm13, %v592_v12, -inf }
 0x3ec   :  { %598 = vmax.xlane.f32.xlu1 %v597_v14 }
 0x3ee   :  { %v585_v15 = vpop.f32.mrf.mxu0 }
 0x3ef   :  { %v590_v17 = vmul.f32 0.35355338, %v585_v15 }
 0x3f1   :  { %v593_v18 = vadd.f32 %v590_v17, %v2356_v0 }
 0x3f3   :  { %v600_v19 = vsel %vm353_vm14, %v593_v18, -inf }
 0x3f4   :  { %601 = vmax.xlane.f32.xlu2 %v600_v19 }
 0x405   :  { %515 = vrot.lane.b32.xlu1 %v2267_v34, %s2084_s2 }
 0x40d   :  { %1931 = vrot.lane.b32.xlu1 %v2224_v13, %s2085_s27 }
 0x415   :  { %1936 = vrot.lane.b32.xlu1 %v2256_v33, %s2085_s27 }
 0x41d   :  { %1941 = vrot.lane.b32.xlu1 %v2224_v13, %s2087_s28 }
 0x457   :  { %v596_v20 = vpop.xlane.xlu0 %595 }
 0x458   :  { %v603_v21 = vsub.f32 %v591_v8, %v596_v20 }
 0x45a   :  { %v606_v22 = vmul.f32 1.442695, %v603_v21 }
 0x45c   :  { %2012 = vpow2.f32 %v606_v22 }
 0x45f   :  { %v599_v24 = vpop.xlane.xlu1 %598 }
 0x460   :  { %v604_v25 = vsub.f32 %v592_v12, %v599_v24 }
 0x462   :  { %v2013_v26 = vpop.eup %2012  ;;  %v608_v27 = vmul.f32 1.442695, %v604_v25 }
 0x463   :  { %v612_v30 = vsel %vm346_vm13, %v2013_v26, 0.0 }
 0x464   :  { %2014 = vpow2.f32 %v608_v27  ;;  %613 = vadd.xlane.f32.xlu0 %v612_v30 }
 0x467   :  { %v602_v31 = vpop.xlane.xlu2 %601 }
 0x468   :  { %v605_v32 = vsub.f32 %v593_v18, %v602_v31 }
 0x46a   :  { %v2015_v35 = vpop.eup %2014  ;;  %v610_v36 = vmul.f32 1.442695, %v605_v32 }
 0x46b   :  { %v615_v37 = vsel %vm346_vm13, %v2015_v35, 0.0 }
 0x46c   :  { %2016 = vpow2.f32 %v610_v36  ;;  %616 = vadd.xlane.f32.xlu2 %v615_v37  ;;  %v2453_v37 = vpop.f32.mrf.mxu3 }
 0x472   :  { %v2017_v28 = vpop.eup %2016 }
 0x473   :  { %v618_v40 = vsel %vm353_vm14, %v2017_v28, 0.0 }
 0x474   :  { %619 = vadd.xlane.f32.xlu0 %v618_v40 }
 0x477   :  { %v516_v42 = vpop.permute.xlu1 %515 }
 0x478   :  { %v542_v43 = vadd.f32 %v541_v41, %v516_v42  ;;  %v539_v44 = vadd.f32 %v538_v39, %v516_v42  ;;  %v536_v45 = vadd.f32 %v535_v29, %v516_v42 }
 0x47a   :  { %1781 = vmatpush.msk.msra.mxu1 %vm390_vm15, %v542_v43 }
 0x47c   :  { %653 = vmatpush.msra.mxu1 %v539_v44 }
 0x47e   :  { %654 = vmatpush.msra.mxu1 %v536_v45 }
 0x47f   :  { %v1932_v46 = vpop.permute.xlu1 %1931 }
 0x480   :  { %v1934_v47 = vunpack.i.h.bf16 %v1932_v46  ;;  %v1933_v48 = vunpack.i.l.bf16 %v1932_v46 }
 0x482   :  { %763 = vmatpush.msra.mxu0 %v1933_v48 }
 0x484   :  { %764 = vmatpush.msra.mxu0 %v1934_v47  ;;  %1921 = vrot.lane.b32.xlu2 %v2224_v13, %s2086_s3 }
 0x487   :  { %v1937_v49 = vpop.permute.xlu1 %1936 }
 0x488   :  { %v1939_v50 = vunpack.i.h.bf16 %v1937_v49  ;;  %v1938_v51 = vunpack.i.l.bf16 %v1937_v49  ;;  %1926 = vrot.lane.b32.xlu0 %v2256_v33, %s2086_s3 }
 0x48a   :  { %765 = vmatpush.msra.mxu0 %v1938_v51 }
 0x48c   :  { %766 = vmatpush.msra.mxu0 %v1939_v50  ;;  %748 = vrot.lane.b32.xlu2 %v2267_v34, %s2085_s27 }
 0x48d   :  { %1791 = vmatmul.msk.f32.vlgmr.msra.gmra.mxu0 %vm79_vm0, %v2296_v23 }
 0x48f   :  { %v1942_v9 = vpop.permute.xlu1 %1941 }
 0x490   :  { %789 = vrot.lane.b32.xlu0 %v2267_v34, %s2086_s3  ;;  %v1944_v10 = vunpack.i.h.bf16 %v1942_v9  ;;  %v1943_v11 = vunpack.i.l.bf16 %v1942_v9 }
 0x492   :  { %845 = vmatpush.msra.mxu2 %v1943_v11 }
 0x494   :  { %846 = vmatpush.msra.mxu2 %v1944_v10 }
 0x495   :  { %1792 = vmatmul.msk.f32.gmra.mxu0 %vm79_vm0, %v2289_v7 }
 0x498   :  { %1946 = vrot.lane.b32.xlu0 %v2256_v33, %s2087_s28 }
 0x49d   :  { %1793 = vmatmul.msk.f32.gmra.mxu0 %vm79_vm0, %v2301_v38 }
 0x4d7   :  { %v614_v52 = vpop.xlane.xlu0 %613 }
 0x4d8   :  { %2018 = vrcp.f32 %v614_v52 }
 0x4de   :  { %v2019_v53 = vpop.eup %2018 }
 0x4df   :  { %v624_v55 = vmul.f32 %v2019_v53, %v2013_v26  ;;  %v617_v56 = vpop.xlane.xlu2 %616 }
 0x4e0   :  { %2020 = vrcp.f32 %v617_v56 }
 0x4e1   :  { %1782 = vmatmul.msk.f32.vlgmr.msra.gmra.mxu1 %vm346_vm13, %v624_v55 }
 0x4e6   :  { %v2021_v57 = vpop.eup %2020 }
 0x4e7   :  { %v620_v58 = vpop.xlane.xlu0 %619  ;;  %v625_v60 = vmul.f32 %v2021_v57, %v2015_v35  ;;  %v1922_v61 = vpop.permute.xlu2 %1921 }
 0x4e8   :  { %2022 = vrcp.f32 %v620_v58  ;;  %v1924_v62 = vunpack.i.h.bf16 %v1922_v61  ;;  %v1923_v63 = vunpack.i.l.bf16 %v1922_v61 }
 0x4e9   :  { %1783 = vmatmul.msk.f32.gmra.mxu1 %vm346_vm13, %v625_v60 }
 0x4ea   :  { %804 = vmatpush.msrb.mxu1 %v1923_v63 }
 0x4ec   :  { %805 = vmatpush.msrb.mxu1 %v1924_v62 }
 0x4ee   :  { %v2023_v1 = vpop.eup %2022 }
 0x4ef   :  { %v626_v2 = vmul.f32 %v2023_v1, %v2017_v28  ;;  %v749_v27 = vpop.permute.xlu2 %748  ;;  %v2457_v28 = vpop.f32.mrf.mxu3 }
 0x4f1   :  { %1784 = vmatmul.msk.f32.gmra.mxu1 %vm346_vm13, %v626_v2 }
 0x4f7   :  { %v733_v41 = vpop.f32.mrf.mxu3 }
 0x4fa   :  { %v1927_v3 = vpop.permute.xlu0 %1926 }
 0x4fb   :  { %v1928_v4 = vunpack.i.l.bf16 %v1927_v3  ;;  %v1929_v5 = vunpack.i.h.bf16 %v1927_v3 }
 0x4fd   :  { %806 = vmatpush.msrb.mxu1 %v1928_v4 }
 0x4ff   :  { %807 = vmatpush.msrb.mxu1 %v1929_v5 }
 0x500   :  { %1794 = vmatmul.msk.f32.vlgmr.msrb.gmra.mxu1 %vm79_vm0, %v2296_v23 }
 0x502   :  { %v790_v8 = vpop.permute.xlu0 %789 }
 0x508   :  { %1795 = vmatmul.msk.f32.gmra.mxu1 %vm79_vm0, %v2289_v7 }
 0x50a   :  { %v1947_v12 = vpop.permute.xlu0 %1946  ;;  %v768_v25 = vpop.f32.mrf.mxu0 }
 0x50b   :  { %v1949_v14 = vunpack.i.h.bf16 %v1947_v12  ;;  %v1948_v15 = vunpack.i.l.bf16 %v1947_v12  ;;  %v769_v30 = vadd.f32 %v768_v25, %v749_v27 }
 0x50d   :  { %847 = vmatpush.msra.mxu2 %v1948_v15 }
 0x50f   :  { %848 = vmatpush.msra.mxu2 %v1949_v14 }
 0x510   :  { %1796 = vmatmul.msk.f32.gmra.mxu1 %vm79_vm0, %v2301_v38 }
 0x512   :  { %v771_v31 = vpop.f32.mrf.mxu0 }
 0x513   :  { %v772_v32 = vadd.f32 %v771_v31, %v749_v27 }
 0x51a   :  { %v774_v35 = vpop.f32.mrf.mxu0 }
 0x51b   :  { %v775_v36 = vadd.f32 %v774_v35, %v749_v27  ;;  %v2072_v27 = vld [vmem:[%s2802_s24 + $0x10] sm:$0xff] }
 0x55e   :  { %v656_v17 = vpop.f32.mrf.mxu1 }
 0x55f   :  { %1785 = vmatmul.msk.f32.vlgmr.msrb.gmra.mxu2 %vm295_vm12, %v656_v17 }
 0x566   :  { %v659_v18 = vpop.f32.mrf.mxu1 }
 0x567   :  { %1786 = vmatmul.msk.f32.gmra.mxu2 %vm295_vm12, %v659_v18 }
 0x56e   :  { %v662_v19 = vpop.f32.mrf.mxu1 }
 0x56f   :  { %1787 = vmatmul.msk.f32.gmra.mxu2 %vm295_vm12, %v662_v19 }
 0x577   :  { %1797 = vmatmul.msk.f32.vlgmr.msra.gmra.mxu2 %vm79_vm0, %v2296_v23 }
 0x57d   :  { %v809_v20 = vpop.f32.mrf.mxu1 }
 0x57e   :  { %v810_v29 = vadd.f32 %v809_v20, %v790_v8 }
 0x57f   :  { %1798 = vmatmul.msk.f32.gmra.mxu2 %vm79_vm0, %v2289_v7 }
 0x585   :  { %v812_v21 = vpop.f32.mrf.mxu1 }
 0x586   :  { %v813_v26 = vadd.f32 %v812_v21, %v790_v8 }
 0x587   :  { %1799 = vmatmul.msk.f32.gmra.mxu2 %vm79_vm0, %v2301_v38 }
 0x58d   :  { %v815_v22 = vpop.f32.mrf.mxu1 }
 0x58e   :  { %v816_v24 = vadd.f32 %v815_v22, %v790_v8 }
 0x590   :  { %1800 = vmatpush.xpose.msk.msrb.mxu3 %vm295_vm12, %v816_v24 }
 0x594   :  { %1801 = vmatpush.xpose.msk.msrb.mxu3 %vm295_vm12, %v813_v26 }
 0x598   :  { %1802 = vmatpush.xpose.msk.msrb.mxu3 %vm295_vm12, %v810_v29 }
 0x59b   :  { %1803 = vmatmul.msk.f32.vlgmr.msrb.gmra.mxu3 %vm295_vm12, %v769_v30  ;;  %v2075_v30 = vld [vmem:[%s2802_s24] sm:$0xff] }
 0x5a3   :  { %1804 = vmatmul.msk.f32.gmra.mxu3 %vm295_vm12, %v772_v32 }
 0x5ab   :  { %1805 = vmatmul.msk.f32.gmra.mxu3 %vm295_vm12, %v775_v36 }
 0x5e2   :  { %v2455_v39 = vpop.f32.mrf.mxu2 }
 0x5ea   :  { %v2459_v40 = vpop.f32.mrf.mxu2 }
 0x5f2   :  { %v698_v42 = vpop.f32.mrf.mxu2 }
 0x5f3   :  { %v2461_v43 = vadd.f32 %v733_v41, %v698_v42 }
 0x5fa   :  { %v850_v6 = vpop.f32.mrf.mxu2 }
 0x602   :  { %v853_v14 = vpop.f32.mrf.mxu2 }
 0x60a   :  { %v856_v21 = vpop.f32.mrf.mxu2 }
 0x61e   :  { %v894_v44 = vpop.f32.mrf.mxu3 }
 0x61f   :  { %v903_v45 = vmul.f32 0.35355338, %v894_v44 }
 0x621   :  { %v906_v46 = vadd.f32 %v903_v45, %v2342_v54 }
 0x623   :  { %v909_v47 = vsel %vm346_vm13, %v906_v46, -inf }
 0x624   :  { %910 = vmax.xlane.f32.xlu2 %v909_v47 }
 0x626   :  { %v897_v48 = vpop.f32.mrf.mxu3 }
 0x627   :  { %v904_v49 = vmul.f32 0.35355338, %v897_v48 }
 0x629   :  { %v907_v50 = vadd.f32 %v904_v49, %v2349_v59 }
 0x62b   :  { %v912_v51 = vsel %vm346_vm13, %v907_v50, -inf }
 0x62c   :  { %913 = vmax.xlane.f32.xlu1 %v912_v51 }
 0x62e   :  { %v900_v52 = vpop.f32.mrf.mxu3 }
 0x62f   :  { %v905_v53 = vmul.f32 0.35355338, %v900_v52 }
 0x631   :  { %v908_v55 = vadd.f32 %v905_v53, %v2356_v0  ;;  %v980_v53 = vld [vmem:[%s2807_s5 + $0x10] sm:$0xff] }
 0x632   :  { %1005 = vmatpush.msra.mxu1 %v980_v53 }
 0x633   :  { %v915_v56 = vsel %vm353_vm14, %v908_v55, -inf }
 0x634   :  { %916 = vmax.xlane.f32.xlu0 %v915_v56 }
 0x63c   :  { %1951 = vrot.lane.b32.xlu2 %v2224_v13, %s2088_s23 }
 0x645   :  { %1956 = vrot.lane.b32.xlu1 %v2256_v33, %s2088_s23 }
 0x648   :  { %830 = vrot.lane.b32.xlu0 %v2267_v34, %s2087_s28 }
 0x697   :  { %v911_v57 = vpop.xlane.xlu2 %910 }
 0x698   :  { %v918_v58 = vsub.f32 %v906_v46, %v911_v57 }
 0x69a   :  { %v921_v60 = vmul.f32 1.442695, %v918_v58 }
 0x69c   :  { %2024 = vpow2.f32 %v921_v60 }
 0x69f   :  { %v914_v61 = vpop.xlane.xlu1 %913  ;;  %v1952_v62 = vpop.permute.xlu2 %1951 }
 0x6a0   :  { %v919_v63 = vsub.f32 %v907_v50, %v914_v61  ;;  %v1954_v1 = vunpack.i.h.bf16 %v1952_v62  ;;  %v1953_v2 = vunpack.i.l.bf16 %v1952_v62 }
 0x6a2   :  { %v2025_v3 = vpop.eup %2024  ;;  %v923_v4 = vmul.f32 1.442695, %v919_v63  ;;  %1087 = vmatpush.msra.mxu3 %v1953_v2 }
 0x6a3   :  { %v927_v5 = vsel %vm346_vm13, %v2025_v3, 0.0 }
 0x6a4   :  { %2026 = vpow2.f32 %v923_v4  ;;  %928 = vadd.xlane.f32.xlu0 %v927_v5  ;;  %1088 = vmatpush.msra.mxu3 %v1954_v1 }
 0x6a7   :  { %v917_v8 = vpop.xlane.xlu0 %916 }
 0x6a8   :  { %v920_v9 = vsub.f32 %v908_v55, %v917_v8 }
 0x6aa   :  { %v2027_v10 = vpop.eup %2026  ;;  %v925_v11 = vmul.f32 1.442695, %v920_v9 }
 0x6ab   :  { %v930_v12 = vsel %vm346_vm13, %v2027_v10, 0.0 }
 0x6ac   :  { %2028 = vpow2.f32 %v925_v11  ;;  %931 = vadd.xlane.f32.xlu2 %v930_v12 }
 0x6b2   :  { %v2029_v15 = vpop.eup %2028 }
 0x6b3   :  { %v933_v17 = vsel %vm353_vm14, %v2029_v15, 0.0 }
 0x6b4   :  { %934 = vadd.xlane.f32.xlu1 %v933_v17 }
 0x6b7   :  { %v1957_v18 = vpop.permute.xlu1 %1956 }
 0x6b8   :  { %v1959_v19 = vunpack.i.h.bf16 %v1957_v18  ;;  %v1958_v20 = vunpack.i.l.bf16 %v1957_v18  ;;  %1961 = vrot.lane.b32.xlu0 %v2224_v13, %s2089_s6  ;;  %v2073_v13 = vld [vmem:[%s2802_s24 + $0x18] sm:$0xff] }
 0x6b9   :  { %v1970_v29 = vpack.i.bf16 %v2072_v27, %v2073_v13  ;;  %v731_v27 = vadd.f32 %v2457_v28, %v2459_v40 }
 0x6ba   :  { %1089 = vmatpush.msra.mxu3 %v1958_v20  ;;  %v831_v22 = vpop.permute.xlu0 %830 }
 0x6bb   :  { %v857_v24 = vadd.f32 %v856_v21, %v831_v22  ;;  %v854_v25 = vadd.f32 %v853_v14, %v831_v22  ;;  %v851_v26 = vadd.f32 %v850_v6, %v831_v22 }
 0x6bc   :  { %1090 = vmatpush.msra.mxu3 %v1959_v19 }
 0x6bd   :  { %1806 = vmatpush.msk.msrb.mxu0 %vm390_vm15, %v857_v24  ;;  %1816 = vmatmul.msk.f32.vlgmr.msra.gmra.mxu3 %vm79_vm0, %v2296_v23  ;;  %v728_v24 = vadd.f32 %v2453_v37, %v2455_v39 }
 0x6bf   :  { %968 = vmatpush.msrb.mxu0 %v854_v25 }
 0x6c0   :  { %1966 = vrot.lane.b32.xlu0 %v2256_v33, %s2089_s6  ;;  %v2074_v33 = vld [vmem:[%s2802_s24 + $0x8] sm:$0xff] }
 0x6c1   :  { %969 = vmatpush.msrb.mxu0 %v851_v26  ;;  %v1975_v31 = vpack.i.bf16 %v2075_v30, %v2074_v33 }
 0x6c4   :  { %1971 = vrot.lane.b32.xlu2 %v1970_v29, %s2090_s4 }
 0x6c5   :  { %1817 = vmatmul.msk.f32.gmra.mxu3 %vm79_vm0, %v2289_v7 }
 0x6c8   :  { %1072 = vrot.lane.b32.xlu0 %v2267_v34, %s2088_s23 }
 0x6cc   :  { %1113 = vrot.lane.b32.xlu2 %v2267_v34, %s2090_s4 }
 0x6cd   :  { %1818 = vmatmul.msk.f32.gmra.mxu3 %vm79_vm0, %v2301_v38 }
 0x6d0   :  { %1031 = vrot.lane.b32.xlu0 %v2267_v34, %s2089_s6 }
 0x6d8   :  { %1976 = vrot.lane.b32.xlu0 %v1975_v31, %s2090_s4 }
 0x717   :  { %v929_v32 = vpop.xlane.xlu0 %928 }
 0x718   :  { %2030 = vrcp.f32 %v929_v32 }
 0x71e   :  { %v2031_v35 = vpop.eup %2030 }
 0x71f   :  { %v939_v36 = vmul.f32 %v2031_v35, %v2025_v3  ;;  %v932_v41 = vpop.xlane.xlu2 %931 }
 0x720   :  { %2032 = vrcp.f32 %v932_v41 }
 0x721   :  { %1807 = vmatmul.msk.f32.vlgmr.msrb.gmra.mxu0 %vm346_vm13, %v939_v36 }
 0x726   :  { %v2033_v42 = vpop.eup %2032 }
 0x727   :  { %v935_v34 = vpop.xlane.xlu1 %934  ;;  %v940_v44 = vmul.f32 %v2033_v42, %v2027_v10  ;;  %v1972_v45 = vpop.permute.xlu2 %1971 }
 0x728   :  { %2034 = vrcp.f32 %v935_v34  ;;  %v1974_v46 = vunpack.i.h.bf16 %v1972_v45  ;;  %v1973_v47 = vunpack.i.l.bf16 %v1972_v45 }
 0x729   :  { %1808 = vmatmul.msk.f32.gmra.mxu0 %vm346_vm13, %v940_v44 }
 0x72a   :  { %v1962_v48 = vpop.permute.xlu0 %1961  ;;  %1128 = vmatpush.msra.mxu0 %v1973_v47 }
 0x72b   :  { %v1963_v49 = vunpack.i.l.bf16 %v1962_v48  ;;  %v1964_v50 = vunpack.i.h.bf16 %v1962_v48 }
 0x72c   :  { %1129 = vmatpush.msra.mxu0 %v1974_v46 }
 0x72d   :  { %1046 = vmatpush.msrb.mxu2 %v1963_v49 }
 0x72e   :  { %v2035_v51 = vpop.eup %2034 }
 0x72f   :  { %1047 = vmatpush.msrb.mxu2 %v1964_v50  ;;  %v941_v52 = vmul.f32 %v2035_v51, %v2029_v15  ;;  %v1114_v18 = vpop.permute.xlu2 %1113 }
 0x731   :  { %1809 = vmatmul.msk.f32.gmra.mxu0 %vm346_vm13, %v941_v52 }
 0x732   :  { %v1967_v55 = vpop.permute.xlu0 %1966 }
 0x733   :  { %v1968_v56 = vunpack.i.l.bf16 %v1967_v55  ;;  %v1969_v57 = vunpack.i.h.bf16 %v1967_v55 }
 0x735   :  { %1048 = vmatpush.msrb.mxu2 %v1968_v56 }
 0x737   :  { %1049 = vmatpush.msrb.mxu2 %v1969_v57  ;;  %v1263_v57 = vld [vmem:[%s2807_s5 + $0x18] sm:$0xff] }
 0x738   :  { %1813 = vmatmul.msk.f32.vlgmr.msrb.gmra.mxu2 %vm79_vm0, %v2296_v23  ;;  %1288 = vmatpush.msrb.mxu3 %v1263_v57  ;;  %v1985_v57 = vld [vmem:[%s2777_s11] ss:$0 sm:$0xff] }
 0x73a   :  { %v1073_v58 = vpop.permute.xlu0 %1072 }
 0x740   :  { %1814 = vmatmul.msk.f32.gmra.mxu2 %vm79_vm0, %v2289_v7  ;;  %v1092_v60 = vpop.f32.mrf.mxu3 }
 0x741   :  { %v1093_v6 = vadd.f32 %v1092_v60, %v1073_v58 }
 0x742   :  { %v1032_v61 = vpop.permute.xlu0 %1031 }
 0x748   :  { %1815 = vmatmul.msk.f32.gmra.mxu2 %vm79_vm0, %v2301_v38  ;;  %v1095_v62 = vpop.f32.mrf.mxu3 }
 0x749   :  { %v1096_v5 = vadd.f32 %v1095_v62, %v1073_v58 }
 0x74a   :  { %v1977_v63 = vpop.permute.xlu0 %1976 }
 0x74b   :  { %v1979_v1 = vunpack.i.h.bf16 %v1977_v63  ;;  %v1978_v2 = vunpack.i.l.bf16 %v1977_v63 }
 0x74d   :  { %1130 = vmatpush.msra.mxu0 %v1978_v2 }
 0x74f   :  { %1131 = vmatpush.msra.mxu0 %v1979_v1 }
 0x750   :  { %v1098_v3 = vpop.f32.mrf.mxu3  ;;  %1819 = vmatmul.msk.f32.vlgmr.msra.gmra.mxu0 %vm79_vm0, %v2296_v23 }
 0x751   :  { %v1099_v4 = vadd.f32 %v1098_v3, %v1073_v58 }
 0x753   :  { %1822 = vmatpush.xpose.msk.msrb.mxu1 %vm295_vm12, %v1099_v4 }
 0x757   :  { %1823 = vmatpush.xpose.msk.msrb.mxu1 %vm295_vm12, %v1096_v5  ;;  %v1312_v5 = vld [vmem:[%s2775_s8 + $0x18] sm:$0xff] }
 0x758   :  { %1820 = vmatmul.msk.f32.gmra.mxu0 %vm79_vm0, %v2289_v7 }
 0x759   :  { %1338 = vmatpush.msrb.mxu0 %v1312_v5 }
 0x75b   :  { %1824 = vmatpush.xpose.msk.msrb.mxu1 %vm295_vm12, %v1093_v6 }
 0x760   :  { %1821 = vmatmul.msk.f32.gmra.mxu0 %vm79_vm0, %v2301_v38 }
 0x79e   :  { %v971_v8 = vpop.f32.mrf.mxu0 }
 0x79f   :  { %1810 = vmatmul.msk.f32.vlgmr.msra.gmra.mxu1 %vm295_vm12, %v971_v8 }
 0x7a6   :  { %v974_v9 = vpop.f32.mrf.mxu0 }
 0x7a7   :  { %1811 = vmatmul.msk.f32.gmra.mxu1 %vm295_vm12, %v974_v9 }
 0x7ae   :  { %v977_v23 = vpop.f32.mrf.mxu0 }
 0x7af   :  { %1812 = vmatmul.msk.f32.gmra.mxu1 %vm295_vm12, %v977_v23  ;;  %v1311_v23 = vld [vmem:[%s2775_s8 + $0x10] sm:$0xff] }
 0x7b0   :  { %1339 = vmatpush.msrb.mxu0 %v1311_v23 }
 0x7bb   :  { %v1051_v10 = vpop.f32.mrf.mxu2 }
 0x7bc   :  { %v1052_v11 = vadd.f32 %v1051_v10, %v1032_v61  ;;  %v1310_v10 = vld [vmem:[%s2775_s8 + $0x8] sm:$0xff] }
 0x7bd   :  { %1340 = vmatpush.msrb.mxu0 %v1310_v10  ;;  %v2078_v10 = vld [vmem:[%s2801_s29 + $0x10] sm:$0x3] }
 0x7be   :  { %1825 = vmatmul.msk.f32.vlgmr.msrb.gmra.mxu1 %vm295_vm12, %v1052_v11  ;;  %v1309_v11 = vld [vmem:[%s2775_s8] sm:$0xff] }
 0x7bf   :  { %1341 = vmatpush.msrb.mxu0 %v1309_v11 }
 0x7c3   :  { %v1054_v7 = vpop.f32.mrf.mxu2 }
 0x7c4   :  { %v1055_v12 = vadd.f32 %v1054_v7, %v1032_v61  ;;  %v1983_v7 = vld [vmem:[%s2774_s7] ss:$0 sm:$0xff] }
 0x7c6   :  { %1826 = vmatmul.msk.f32.gmra.mxu1 %vm295_vm12, %v1055_v12 }
 0x7cb   :  { %v1057_v14 = vpop.f32.mrf.mxu2 }
 0x7cc   :  { %v1058_v15 = vadd.f32 %v1057_v14, %v1032_v61 }
 0x7cd   :  { %v1133_v38 = vpop.f32.mrf.mxu0 }
 0x7ce   :  { %1827 = vmatmul.msk.f32.gmra.mxu1 %vm295_vm12, %v1058_v15  ;;  %v1134_v22 = vadd.f32 %v1133_v38, %v1114_v18 }
 0x7d5   :  { %v1136_v17 = vpop.f32.mrf.mxu0 }
 0x7d6   :  { %v1137_v21 = vadd.f32 %v1136_v17, %v1114_v18 }
 0x7dd   :  { %v1139_v19 = vpop.f32.mrf.mxu0 }
 0x7de   :  { %v1140_v20 = vadd.f32 %v1139_v19, %v1114_v18 }
 0x7e0   :  { %1828 = vmatpush.msk.msra.mxu2 %vm390_vm15, %v1140_v20 }
 0x7e2   :  { %1251 = vmatpush.msra.mxu2 %v1137_v21 }
 0x7e4   :  { %1252 = vmatpush.msra.mxu2 %v1134_v22  ;;  %v1380_v22 = vld [vmem:[%s2778_s10 + $0x8] sm:$0xff] }
 0x7e5   :  { %1409 = vmatpush.msra.mxu1 %v1380_v22 }
 0x81c   :  { %v1007_v25 = vpop.f32.mrf.mxu1 }
 0x81d   :  { %v2533_v26 = vadd.f32 %v1007_v25, %v728_v24  ;;  %v1379_v24 = vld [vmem:[%s2778_s10] sm:$0xff] }
 0x81e   :  { %1410 = vmatpush.msra.mxu1 %v1379_v24  ;;  %v1984_v25 = vld [vmem:[%s2776_s9] ss:$0 sm:$0xff] }
 0x824   :  { %v1010_v13 = vpop.f32.mrf.mxu1 }
 0x825   :  { %v2537_v29 = vadd.f32 %v1010_v13, %v731_v27 }
 0x82c   :  { %v1013_v33 = vpop.f32.mrf.mxu1 }
 0x82d   :  { %v2540_v30 = vadd.f32 %v1013_v33, %v2461_v43 }
 0x83b   :  { %v1177_v31 = vpop.f32.mrf.mxu1 }
 0x83c   :  { %v1186_v32 = vmul.f32 0.35355338, %v1177_v31 }
 0x83e   :  { %v1189_v35 = vadd.f32 %v1186_v32, %v2342_v54 }
 0x840   :  { %v1192_v36 = vsel %vm346_vm13, %v1189_v35, -inf }
 0x841   :  { %1193 = vmax.xlane.f32.xlu1 %v1192_v36 }
 0x843   :  { %v1180_v37 = vpop.f32.mrf.mxu1 }
 0x844   :  { %v1187_v39 = vmul.f32 0.35355338, %v1180_v37 }
 0x846   :  { %v1190_v41 = vadd.f32 %v1187_v39, %v2349_v59 }
 0x848   :  { %v1195_v28 = vsel %vm346_vm13, %v1190_v41, -inf }
 0x849   :  { %1196 = vmax.xlane.f32.xlu0 %v1195_v28 }
 0x84b   :  { %v1183_v40 = vpop.f32.mrf.mxu1 }
 0x84c   :  { %v1188_v42 = vmul.f32 0.35355338, %v1183_v40 }
 0x84e   :  { %v1191_v34 = vadd.f32 %v1188_v42, %v2356_v0 }
 0x850   :  { %v1198_v43 = vsel %vm353_vm14, %v1191_v34, -inf }
 0x851   :  { %1199 = vmax.xlane.f32.xlu1 %v1198_v43 }
 0x8b4   :  { %v1194_v44 = vpop.xlane.xlu1 %1193 }
 0x8b5   :  { %v1201_v45 = vsub.f32 %v1189_v35, %v1194_v44 }
 0x8b7   :  { %v1204_v54 = vmul.f32 1.442695, %v1201_v45 }
 0x8b9   :  { %2036 = vpow2.f32 %v1204_v54 }
 0x8bc   :  { %v1197_v46 = vpop.xlane.xlu0 %1196 }
 0x8bd   :  { %v1202_v47 = vsub.f32 %v1190_v41, %v1197_v46 }
 0x8bf   :  { %v2037_v48 = vpop.eup %2036  ;;  %v1206_v49 = vmul.f32 1.442695, %v1202_v47 }
 0x8c0   :  { %v1210_v59 = vsel %vm346_vm13, %v2037_v48, 0.0 }
 0x8c1   :  { %2038 = vpow2.f32 %v1206_v49  ;;  %1211 = vadd.xlane.f32.xlu1 %v1210_v59 }
 0x8c4   :  { %v1200_v50 = vpop.xlane.xlu1 %1199 }
 0x8c5   :  { %v1203_v51 = vsub.f32 %v1191_v34, %v1200_v50 }
 0x8c7   :  { %v2039_v52 = vpop.eup %2038  ;;  %v1208_v53 = vmul.f32 1.442695, %v1203_v51 }
 0x8c8   :  { %v1213_v0 = vsel %vm346_vm13, %v2039_v52, 0.0 }
 0x8c9   :  { %2040 = vpow2.f32 %v1208_v53  ;;  %1214 = vadd.xlane.f32.xlu1 %v1213_v0 }
 0x8cf   :  { %v2041_v55 = vpop.eup %2040 }
 0x8d0   :  { %v1216_v56 = vsel %vm353_vm14, %v2041_v55, 0.0 }
 0x8d1   :  { %1217 = vadd.xlane.f32.xlu2 %v1216_v56 }
 0x934   :  { %v1212_v58 = vpop.xlane.xlu1 %1211 }
 0x935   :  { %2042 = vrcp.f32 %v1212_v58 }
 0x93b   :  { %v2043_v60 = vpop.eup %2042 }
 0x93c   :  { %v1222_v61 = vmul.f32 %v2043_v60, %v2037_v48  ;;  %v1215_v62 = vpop.xlane.xlu1 %1214 }
 0x93d   :  { %2044 = vrcp.f32 %v1215_v62 }
 0x93e   :  { %1829 = vmatmul.msk.f32.vlgmr.msra.gmra.mxu2 %vm346_vm13, %v1222_v61  ;;  %v2076_v61 = vld [vmem:[%s2801_s29] sm:$0xff] }
 0x943   :  { %v2045_v63 = vpop.eup %2044 }
 0x944   :  { %v1218_v1 = vpop.xlane.xlu2 %1217  ;;  %v1223_v2 = vmul.f32 %v2045_v63, %v2039_v52 }
 0x945   :  { %2046 = vrcp.f32 %v1218_v1 }
 0x946   :  { %1830 = vmatmul.msk.f32.gmra.mxu2 %vm346_vm13, %v1223_v2 }
 0x94b   :  { %v2047_v3 = vpop.eup %2046 }
 0x94c   :  { %v1224_v4 = vmul.f32 %v2047_v3, %v2041_v55 }
 0x94e   :  { %1831 = vmatmul.msk.f32.gmra.mxu2 %vm346_vm13, %v1224_v4  ;;  %v2077_v4 = vld [vmem:[%s2801_s29 + $0x8] sm:$0xff] }
 0x9c1   :  { %v1254_v6 = vpop.f32.mrf.mxu2 }
 0x9c2   :  { %1832 = vmatmul.msk.f32.vlgmr.msrb.gmra.mxu3 %vm295_vm12, %v1254_v6 }
 0x9c9   :  { %v1257_v8 = vpop.f32.mrf.mxu2 }
 0x9ca   :  { %1833 = vmatmul.msk.f32.gmra.mxu3 %vm295_vm12, %v1257_v8 }
 0x9d1   :  { %v1260_v9 = vpop.f32.mrf.mxu2 }
 0x9d2   :  { %1834 = vmatmul.msk.f32.gmra.mxu3 %vm295_vm12, %v1260_v9 }
 0xa45   :  { %v1290_v12 = vpop.f32.mrf.mxu3 }
 0xa46   :  { %v1299_v14 = vadd.f32 %v1290_v12, %v2533_v26 }
 0xa48   :  { %v1306_v15 = vadd.f32 %v1983_v7, %v1299_v14 }
 0xa4a   :  { %1835 = vmatmul.msk.f32.vlgmr.msrb.gmra.mxu0 %vm79_vm0, %v1306_v15  ;;  %v1421_v62 = vadd.f32 %v2076_v61, %v1306_v15 }
 0xa4d   :  { %v1293_v38 = vpop.f32.mrf.mxu3 }
 0xa4e   :  { %v1300_v17 = vadd.f32 %v1293_v38, %v2537_v29 }
 0xa50   :  { %v2578_v18 = vadd.f32 %v1983_v7, %v1300_v17 }
 0xa52   :  { %1836 = vmatmul.msk.f32.gmra.mxu0 %vm79_vm0, %v2578_v18  ;;  %v1422_v5 = vadd.f32 %v2077_v4, %v2578_v18 }
 0xa55   :  { %v1296_v19 = vpop.f32.mrf.mxu3 }
 0xa56   :  { %v1301_v20 = vadd.f32 %v1296_v19, %v2540_v30 }
 0xa58   :  { %v2583_v21 = vadd.f32 %v1983_v7, %v1301_v20 }
 0xa5a   :  { %1837 = vmatmul.msk.f32.gmra.mxu0 %vm79_vm0, %v2583_v21  ;;  %v1423_v11 = vadd.f32 %v2078_v10, %v2583_v21 }
 0xac7   :  { %v1343_v26 = vpop.f32.mrf.mxu0 }
 0xac8   :  { %v1344_v27 = vadd.f32 %v1984_v25, %v1343_v26 }
 0xaca   :  { %v1355_v13 = vmul.f32 0.044715, %v1344_v27  ;;  %v1352_v44 = vmul.f32 0.5, %v1344_v27 }
 0xacc   :  { %v1358_v29 = vmul.f32 %v1355_v13, %v1344_v27 }
 0xace   :  { %v1361_v33 = vmul.f32 %v1358_v29, %v1344_v27 }
 0xacf   :  { %v1346_v30 = vpop.f32.mrf.mxu0 }
 0xad0   :  { %v1364_v31 = vadd.f32 %v1361_v33, %v1344_v27  ;;  %v1347_v32 = vadd.f32 %v1984_v25, %v1346_v30  ;;  %v1510_v33 = vld [vmem:[%s2782_s14 + $0x18] sm:$0xff]  ;;  %v1509_v30 = vld [vmem:[%s2782_s14 + $0x10] sm:$0xff] }
 0xad1   :  { %1536 = vmatpush.msrb.mxu2 %v1510_v33  ;;  %v1988_v33 = vld [vmem:[%s2781_s15] ss:$0 sm:$0xff] }
 0xad2   :  { %v1367_v35 = vmul.f32 0.7978845, %v1364_v31  ;;  %v1356_v36 = vmul.f32 0.044715, %v1347_v32  ;;  %v1353_v50 = vmul.f32 0.5, %v1347_v32  ;;  %v1508_v31 = vld [vmem:[%s2782_s14 + $0x8] sm:$0xff] }
 0xad3   :  { %1537 = vmatpush.msrb.mxu2 %v1509_v30 }
 0xad4   :  { %2048 = vtanh.f32 %v1367_v35  ;;  %v1359_v37 = vmul.f32 %v1356_v36, %v1347_v32 }
 0xad5   :  { %1538 = vmatpush.msrb.mxu2 %v1508_v31 }
 0xad6   :  { %v1362_v39 = vmul.f32 %v1359_v37, %v1347_v32 }
 0xad7   :  { %v1349_v41 = vpop.f32.mrf.mxu0 }
 0xad8   :  { %v1350_v28 = vadd.f32 %v1984_v25, %v1349_v41  ;;  %v1365_v40 = vadd.f32 %v1362_v39, %v1347_v32  ;;  %v1507_v32 = vld [vmem:[%s2782_s14] sm:$0xff] }
 0xad9   :  { %1539 = vmatpush.msrb.mxu2 %v1507_v32 }
 0xada   :  { %v2049_v42 = vpop.eup %2048  ;;  %v1357_v34 = vmul.f32 0.044715, %v1350_v28  ;;  %v1368_v43 = vmul.f32 0.7978845, %v1365_v40  ;;  %v1354_v0 = vmul.f32 0.5, %v1350_v28 }
 0xadb   :  { %v1373_v45 = vadd.f32 1.0, %v2049_v42 }
 0xadc   :  { %2050 = vtanh.f32 %v1368_v43  ;;  %v1360_v54 = vmul.f32 %v1357_v34, %v1350_v28  ;;  %v1592_v34 = vld [vmem:[%s2783_s16 + $0x78] sm:$0xff]  ;;  %v1591_v43 = vld [vmem:[%s2783_s16 + $0x70] sm:$0xff] }
 0xadd   :  { %v1376_v46 = vmul.f32 %v1373_v45, %v1352_v44  ;;  %1597 = vmatpush.msra.mxu3 %v1592_v34  ;;  %v1590_v45 = vld [vmem:[%s2783_s16 + $0x68] sm:$0xff] }
 0xade   :  { %v1363_v47 = vmul.f32 %v1360_v54, %v1350_v28 }
 0xadf   :  { %1838 = vmatmul.msk.f32.vlgmr.msra.gmra.mxu1 %vm1385_vm2, %v1376_v46  ;;  %1598 = vmatpush.msra.mxu3 %v1591_v43 }
 0xae0   :  { %v1366_v48 = vadd.f32 %v1363_v47, %v1350_v28 }
 0xae1   :  { %1599 = vmatpush.msra.mxu3 %v1590_v45 }
 0xae2   :  { %v2051_v49 = vpop.eup %2050  ;;  %v1369_v59 = vmul.f32 0.7978845, %v1366_v48  ;;  %v1589_v48 = vld [vmem:[%s2783_s16 + $0x60] sm:$0xff] }
 0xae3   :  { %v1374_v51 = vadd.f32 1.0, %v2051_v49  ;;  %1600 = vmatpush.msra.mxu3 %v1589_v48 }
 0xae4   :  { %2052 = vtanh.f32 %v1369_v59 }
 0xae5   :  { %v1377_v52 = vmul.f32 %v1374_v51, %v1353_v50 }
 0xae7   :  { %1839 = vmatmul.msk.f32.gmra.mxu1 %vm1385_vm2, %v1377_v52 }
 0xaea   :  { %v2053_v53 = vpop.eup %2052 }
 0xaeb   :  { %v1375_v55 = vadd.f32 1.0, %v2053_v53  ;;  %v1986_v53 = vld [vmem:[%s2779_s12] ss:$0 sm:$0xff] }
 0xaed   :  { %v1378_v56 = vmul.f32 %v1375_v55, %v1354_v0 }
 0xaef   :  { %1840 = vmatmul.msk.f32.gmra.mxu1 %vm1385_vm2, %v1378_v56  ;;  %v1987_v56 = vld [vmem:[%s2780_s13] ss:$0 sm:$0xff] }
 0xb5c   :  { %v1412_v58 = vpop.f32.mrf.mxu1 }
 0xb5d   :  { %v1413_v60 = vadd.f32 %v1985_v57, %v1412_v58 }
 0xb5f   :  { %v2605_v63 = vadd.f32 %v1421_v62, %v1413_v60 }
 0xb61   :  { %v1429_v1 = vsel %vm79_vm0, %v2605_v63, 0.0 }
 0xb62   :  { %1430 = vadd.xlane.f32.xlu1 %v1429_v1 }
 0xb64   :  { %v1415_v2 = vpop.f32.mrf.mxu1 }
 0xb65   :  { %v1416_v3 = vadd.f32 %v1985_v57, %v1415_v2 }
 0xb67   :  { %v2613_v6 = vadd.f32 %v1422_v5, %v1416_v3 }
 0xb69   :  { %v1432_v8 = vsel %vm79_vm0, %v2613_v6, 0.0 }
 0xb6a   :  { %1433 = vadd.xlane.f32.xlu1 %v1432_v8 }
 0xb6c   :  { %v1418_v9 = vpop.f32.mrf.mxu1 }
 0xb6d   :  { %v1419_v23 = vadd.f32 %v1985_v57, %v1418_v9 }
 0xb6f   :  { %v2621_v7 = vadd.f32 %v1423_v11, %v1419_v23 }
 0xb71   :  { %v1435_v12 = vsel %vm86_vm1, %v2621_v7, 0.0 }
 0xb72   :  { %1436 = vadd.xlane.f32.xlu0 %v1435_v12 }
 0xbd5   :  { %v1431_v14 = vpop.xlane.xlu1 %1430 }
 0xbd6   :  { %v1438_v15 = vmul.f32 %v1431_v14, %v2231_v16 }
 0xbd8   :  { %v1441_v38 = vsub.f32 %v2605_v63, %v1438_v15 }
 0xbda   :  { %v1444_v17 = vmul.f32 %v1441_v38, %v1441_v38 }
 0xbdc   :  { %v1447_v18 = vsel %vm79_vm0, %v1444_v17, 0.0  ;;  %v1588_v17 = vld [vmem:[%s2783_s16 + $0x58] sm:$0xff] }
 0xbdd   :  { %1448 = vadd.xlane.f32.xlu1 %v1447_v18  ;;  %v1434_v19 = vpop.xlane.xlu1 %1433  ;;  %1601 = vmatpush.msra.mxu3 %v1588_v17  ;;  %v1587_v18 = vld [vmem:[%s2783_s16 + $0x50] sm:$0xff] }
 0xbde   :  { %v1439_v20 = vmul.f32 %v1434_v19, %v2231_v16  ;;  %v1586_v19 = vld [vmem:[%s2783_s16 + $0x48] sm:$0xff] }
 0xbdf   :  { %1602 = vmatpush.msra.mxu3 %v1587_v18 }
 0xbe0   :  { %v2630_v21 = vsub.f32 %v2613_v6, %v1439_v20  ;;  %v1585_v20 = vld [vmem:[%s2783_s16 + $0x40] sm:$0xff] }
 0xbe1   :  { %1603 = vmatpush.msra.mxu3 %v1586_v19 }
 0xbe2   :  { %v1445_v22 = vmul.f32 %v2630_v21, %v2630_v21 }
 0xbe3   :  { %1604 = vmatpush.msra.mxu3 %v1585_v20 }
 0xbe4   :  { %v1450_v24 = vsel %vm79_vm0, %v1445_v22, 0.0  ;;  %v1583_v22 = vld [vmem:[%s2783_s16 + $0x30] sm:$0xff] }
 0xbe5   :  { %v1437_v25 = vpop.xlane.xlu0 %1436  ;;  %1451 = vadd.xlane.f32.xlu0 %v1450_v24  ;;  %v1582_v24 = vld [vmem:[%s2783_s16 + $0x28] sm:$0xff] }
 0xbe6   :  { %v1440_v26 = vmul.f32 %v1437_v25, %v2231_v16  ;;  %v1581_v25 = vld [vmem:[%s2783_s16 + $0x20] sm:$0xff] }
 0xbe8   :  { %v2637_v27 = vsub.f32 %v2621_v7, %v1440_v26  ;;  %v1580_v26 = vld [vmem:[%s2783_s16 + $0x18] sm:$0xff] }
 0xbea   :  { %v1446_v13 = vmul.f32 %v2637_v27, %v2637_v27 }
 0xbec   :  { %v1453_v29 = vsel %vm86_vm1, %v1446_v13, 0.0  ;;  %v1578_v13 = vld [vmem:[%s2783_s16 + $0x8] sm:$0xff] }
 0xbed   :  { %1454 = vadd.xlane.f32.xlu1 %v1453_v29  ;;  %v1577_v29 = vld [vmem:[%s2783_s16] sm:$0xff] }
 0xc50   :  { %v1449_v35 = vpop.xlane.xlu1 %1448 }
 0xc51   :  { %v1456_v36 = vmul.f32 %v1449_v35, %v2231_v16 }
 0xc53   :  { %v1459_v37 = vadd.f32 1e-05, %v1456_v36 }
 0xc55   :  { %2054 = vrsqrt.f32 %v1459_v37  ;;  %vm1468_vm4 = vweird.f32 %v1459_v37 }
 0xc58   :  { %v1452_v39 = vpop.xlane.xlu0 %1451 }
 0xc59   :  { %v1457_v41 = vmul.f32 %v1452_v39, %v2231_v16  ;;  %v1626_v39 = vld [vmem:[%s2785_s18 + $0x18] sm:$0xff] }
 0xc5a   :  { %1652 = vmatpush.msra.mxu0 %v1626_v39 }
 0xc5b   :  { %v2055_v28 = vpop.eup %2054  ;;  %v1460_v40 = vadd.f32 1e-05, %v1457_v41  ;;  %v1625_v41 = vld [vmem:[%s2785_s18 + $0x10] sm:$0xff] }
 0xc5c   :  { %v1463_v42 = vmul.f32 %v2055_v28, %v1459_v37  ;;  %vm1469_vm3 = vweird.f32 %v2055_v28  ;;  %1653 = vmatpush.msra.mxu0 %v1625_v41 }
 0xc5d   :  { %2056 = vrsqrt.f32 %v1460_v40  ;;  %vm1470_vm5 = vmor %vm1468_vm4, %vm1469_vm3  ;;  %vm1478_vm7 = vweird.f32 %v1460_v40 }
 0xc5e   :  { %v1464_v44 = vmul.f32 %v2055_v28, %v1463_v42 }
 0xc60   :  { %v1465_v54 = vmul.f32 0.5, %v1464_v44  ;;  %v1455_v46 = vpop.xlane.xlu1 %1454 }
 0xc61   :  { %v1458_v47 = vmul.f32 %v1455_v46, %v2231_v16 }
 0xc62   :  { %v1466_v49 = vsub.f32 1.5, %v1465_v54 }
 0xc63   :  { %v2057_v59 = vpop.eup %2056  ;;  %v1461_v50 = vadd.f32 1e-05, %v1458_v47 }
 0xc64   :  { %v1467_v51 = vmul.f32 %v2055_v28, %v1466_v49  ;;  %v1473_v52 = vmul.f32 %v2057_v59, %v1460_v40  ;;  %vm1479_vm6 = vweird.f32 %v2057_v59 }
 0xc65   :  { %2058 = vrsqrt.f32 %v1461_v50  ;;  %vm1480_vm8 = vmor %vm1478_vm7, %vm1479_vm6  ;;  %vm1488_vm10 = vweird.f32 %v1461_v50 }
 0xc66   :  { %v1471_v16 = vsel %vm1470_vm5, %v2055_v28, %v1467_v51  ;;  %v1474_v0 = vmul.f32 %v2057_v59, %v1473_v52 }
 0xc67   :  { %v1492_v55 = vmul.f32 %v1471_v16, %v1441_v38 }
 0xc68   :  { %v1475_v57 = vmul.f32 0.5, %v1474_v0 }
 0xc69   :  { %v1498_v58 = vmul.f32 %v1986_v53, %v1492_v55 }
 0xc6a   :  { %v1476_v60 = vsub.f32 1.5, %v1475_v57 }
 0xc6b   :  { %v2059_v61 = vpop.eup %2058  ;;  %v1504_v62 = vadd.f32 %v1987_v56, %v1498_v58 }
 0xc6c   :  { %v1477_v1 = vmul.f32 %v2057_v59, %v1476_v60  ;;  %v1483_v2 = vmul.f32 %v2059_v61, %v1461_v50  ;;  %vm1489_vm9 = vweird.f32 %v2059_v61 }
 0xc6d   :  { %1841 = vmatmul.msk.f32.vlgmr.msrb.gmra.mxu2 %vm79_vm0, %v1504_v62  ;;  %vm1490_vm11 = vmor %vm1488_vm10, %vm1489_vm9 }
 0xc6e   :  { %v1481_v3 = vsel %vm1480_vm8, %v2057_v59, %v1477_v1  ;;  %v1484_v4 = vmul.f32 %v2059_v61, %v1483_v2  ;;  %v1624_v2 = vld [vmem:[%s2785_s18 + $0x8] sm:$0xff] }
 0xc6f   :  { %v1493_v5 = vmul.f32 %v1481_v3, %v2630_v21  ;;  %v1584_v21 = vld [vmem:[%s2783_s16 + $0x38] sm:$0xff]  ;;  %1654 = vmatpush.msra.mxu0 %v1624_v2  ;;  %v1623_v3 = vld [vmem:[%s2785_s18] sm:$0xff] }
 0xc70   :  { %v1485_v8 = vmul.f32 0.5, %v1484_v4  ;;  %1605 = vmatpush.msra.mxu3 %v1584_v21  ;;  %v1989_v4 = vld [vmem:[%s2784_s17] ss:$0 sm:$0xff] }
 0xc71   :  { %v1499_v9 = vmul.f32 %v1986_v53, %v1493_v5  ;;  %1655 = vmatpush.msra.mxu0 %v1623_v3 }
 0xc72   :  { %v1486_v23 = vsub.f32 1.5, %v1485_v8  ;;  %1606 = vmatpush.msra.mxu3 %v1583_v22 }
 0xc73   :  { %v1505_v10 = vadd.f32 %v1987_v56, %v1499_v9 }
 0xc74   :  { %v1487_v11 = vmul.f32 %v2059_v61, %v1486_v23  ;;  %1607 = vmatpush.msra.mxu3 %v1582_v24 }
 0xc75   :  { %1842 = vmatmul.msk.f32.gmra.mxu2 %vm79_vm0, %v1505_v10 }
 0xc76   :  { %v1491_v12 = vsel %vm1490_vm11, %v2059_v61, %v1487_v11  ;;  %1608 = vmatpush.msra.mxu3 %v1581_v25 }
 0xc77   :  { %v1494_v14 = vmul.f32 %v1491_v12, %v2637_v27  ;;  %v1579_v27 = vld [vmem:[%s2783_s16 + $0x10] sm:$0xff]  ;;  %v1694_v12 = vld [vmem:[%s2788_s20 + $0x8] sm:$0xff] }
 0xc78   :  { %1609 = vmatpush.msra.mxu3 %v1580_v26  ;;  %1722 = vmatpush.msrb.mxu1 %v1694_v12 }
 0xc79   :  { %v1500_v15 = vmul.f32 %v1986_v53, %v1494_v14  ;;  %v1693_v14 = vld [vmem:[%s2788_s20] sm:$0xff] }
 0xc7a   :  { %1610 = vmatpush.msra.mxu3 %v1579_v27  ;;  %1723 = vmatpush.msrb.mxu1 %v1693_v14 }
 0xc7b   :  { %v1506_v38 = vadd.f32 %v1987_v56, %v1500_v15  ;;  %v1990_v15 = vld [vmem:[%s2786_s19] ss:$0 sm:$0xff] }
 0xc7c   :  { %1611 = vmatpush.msra.mxu3 %v1578_v13 }
 0xc7d   :  { %1843 = vmatmul.msk.f32.gmra.mxu2 %vm79_vm0, %v1506_v38 }
 0xc7e   :  { %1612 = vmatpush.msra.mxu3 %v1577_v29 }
 0xcf0   :  { %v1541_v30 = vpop.f32.mrf.mxu2 }
 0xcf1   :  { %v1542_v31 = vadd.f32 %v1988_v33, %v1541_v30 }
 0xcf3   :  { %v1553_v32 = vmul.f32 0.044715, %v1542_v31  ;;  %v1550_v59 = vmul.f32 0.5, %v1542_v31 }
 0xcf5   :  { %v1556_v35 = vmul.f32 %v1553_v32, %v1542_v31 }
 0xcf7   :  { %v1559_v36 = vmul.f32 %v1556_v35, %v1542_v31 }
 0xcf8   :  { %v1544_v37 = vpop.f32.mrf.mxu2 }
 0xcf9   :  { %v1545_v28 = vadd.f32 %v1988_v33, %v1544_v37  ;;  %v1562_v40 = vadd.f32 %v1559_v36, %v1542_v31 }
 0xcfb   :  { %v1565_v42 = vmul.f32 0.7978845, %v1562_v40  ;;  %v1554_v34 = vmul.f32 0.044715, %v1545_v28  ;;  %v1551_v56 = vmul.f32 0.5, %v1545_v28 }
 0xcfd   :  { %2060 = vtanh.f32 %v1565_v42  ;;  %v1557_v43 = vmul.f32 %v1554_v34, %v1545_v28 }
 0xcff   :  { %v1560_v44 = vmul.f32 %v1557_v43, %v1545_v28 }
 0xd00   :  { %v1547_v45 = vpop.f32.mrf.mxu2 }
 0xd01   :  { %v1548_v54 = vadd.f32 %v1988_v33, %v1547_v45  ;;  %v1563_v46 = vadd.f32 %v1560_v44, %v1545_v28 }
 0xd03   :  { %v2061_v47 = vpop.eup %2060  ;;  %v1566_v48 = vmul.f32 0.7978845, %v1563_v46  ;;  %v1555_v49 = vmul.f32 0.044715, %v1548_v54  ;;  %v1552_v61 = vmul.f32 0.5, %v1548_v54 }
 0xd04   :  { %v1571_v50 = vadd.f32 1.0, %v2061_v47 }
 0xd05   :  { %2062 = vtanh.f32 %v1566_v48  ;;  %v1558_v51 = vmul.f32 %v1555_v49, %v1548_v54  ;;  %v1991_v49 = vld [vmem:[%s2787_s21] ss:$0 sm:$0xff] }
 0xd06   :  { %v1574_v52 = vmul.f32 %v1571_v50, %v1550_v59 }
 0xd07   :  { %v1561_v53 = vmul.f32 %v1558_v51, %v1548_v54 }
 0xd08   :  { %1613 = vmatmul.f32.vlgmr.msra.gmra.mxu3 %v1574_v52 }
 0xd09   :  { %v1564_v16 = vadd.f32 %v1561_v53, %v1548_v54 }
 0xd0b   :  { %v2063_v0 = vpop.eup %2062  ;;  %v1567_v55 = vmul.f32 0.7978845, %v1564_v16 }
 0xd0c   :  { %v1572_v57 = vadd.f32 1.0, %v2063_v0 }
 0xd0d   :  { %2064 = vtanh.f32 %v1567_v55 }
 0xd0e   :  { %v1575_v58 = vmul.f32 %v1572_v57, %v1551_v56 }
 0xd10   :  { %1616 = vmatmul.f32.gmra.mxu3 %v1575_v58 }
 0xd13   :  { %v2065_v60 = vpop.eup %2064 }
 0xd14   :  { %v1573_v62 = vadd.f32 1.0, %v2065_v60 }
 0xd16   :  { %v1576_v1 = vmul.f32 %v1573_v62, %v1552_v61 }
 0xd18   :  { %1619 = vmatmul.f32.gmra.mxu3 %v1576_v1 }
 0xd8b   :  { %v1614_v5 = vpop.f32.mrf.mxu3 }
 0xd8c   :  { %v1615_v8 = vadd.f32 %v1989_v4, %v1614_v5 }
 0xd8e   :  { %1844 = vmatmul.msk.f32.vlgmr.msra.gmra.mxu0 %vm79_vm0, %v1615_v8  ;;  %v1734_v50 = vadd.f32 %v1615_v8, %v2605_v63 }
 0xd93   :  { %v1617_v9 = vpop.f32.mrf.mxu3 }
 0xd94   :  { %v1618_v23 = vadd.f32 %v1989_v4, %v1617_v9 }
 0xd96   :  { %1845 = vmatmul.msk.f32.gmra.mxu0 %vm79_vm0, %v1618_v23  ;;  %v1735_v16 = vadd.f32 %v1618_v23, %v2613_v6 }
 0xd9b   :  { %v1620_v10 = vpop.f32.mrf.mxu3 }
 0xd9c   :  { %v1621_v11 = vadd.f32 %v1989_v4, %v1620_v10 }
 0xd9e   :  { %1846 = vmatmul.msk.f32.gmra.mxu0 %vm79_vm0, %v1621_v11  ;;  %v1736_v63 = vadd.f32 %v1621_v11, %v2621_v7 }
 0xe0b   :  { %v1657_v38 = vpop.f32.mrf.mxu0 }
 0xe0c   :  { %v1658_v17 = vadd.f32 %v1990_v15, %v1657_v38 }
 0xe0e   :  { %v1669_v18 = vmul.f32 0.044715, %v1658_v17  ;;  %v1666_v36 = vmul.f32 0.5, %v1658_v17 }
 0xe10   :  { %v1672_v19 = vmul.f32 %v1669_v18, %v1658_v17 }
 0xe12   :  { %v1675_v20 = vmul.f32 %v1672_v19, %v1658_v17 }
 0xe13   :  { %v1660_v21 = vpop.f32.mrf.mxu0 }
 0xe14   :  { %v1678_v22 = vadd.f32 %v1675_v20, %v1658_v17  ;;  %v1661_v24 = vadd.f32 %v1990_v15, %v1660_v21 }
 0xe16   :  { %v1681_v25 = vmul.f32 0.7978845, %v1678_v22  ;;  %v1670_v26 = vmul.f32 0.044715, %v1661_v24  ;;  %v1667_v43 = vmul.f32 0.5, %v1661_v24 }
 0xe18   :  { %2066 = vtanh.f32 %v1681_v25  ;;  %v1673_v27 = vmul.f32 %v1670_v26, %v1661_v24 }
 0xe1a   :  { %v1676_v13 = vmul.f32 %v1673_v27, %v1661_v24 }
 0xe1b   :  { %v1663_v29 = vpop.f32.mrf.mxu0 }
 0xe1c   :  { %v1664_v33 = vadd.f32 %v1990_v15, %v1663_v29  ;;  %v1679_v30 = vadd.f32 %v1676_v13, %v1661_v24 }
 0xe1e   :  { %v2067_v31 = vpop.eup %2066  ;;  %v1671_v32 = vmul.f32 0.044715, %v1664_v33  ;;  %v1682_v35 = vmul.f32 0.7978845, %v1679_v30  ;;  %v1668_v46 = vmul.f32 0.5, %v1664_v33 }
 0xe1f   :  { %v1687_v37 = vadd.f32 1.0, %v2067_v31 }
 0xe20   :  { %2068 = vtanh.f32 %v1682_v35  ;;  %v1674_v39 = vmul.f32 %v1671_v32, %v1664_v33 }
 0xe21   :  { %v1690_v41 = vmul.f32 %v1687_v37, %v1666_v36 }
 0xe22   :  { %v1677_v28 = vmul.f32 %v1674_v39, %v1664_v33 }
 0xe23   :  { %1847 = vmatmul.msk.f32.vlgmr.msrb.gmra.mxu1 %vm1385_vm2, %v1690_v41 }
 0xe24   :  { %v1680_v40 = vadd.f32 %v1677_v28, %v1664_v33 }
 0xe26   :  { %v2069_v42 = vpop.eup %2068  ;;  %v1683_v34 = vmul.f32 0.7978845, %v1680_v40 }
 0xe27   :  { %v1688_v44 = vadd.f32 1.0, %v2069_v42 }
 0xe28   :  { %2070 = vtanh.f32 %v1683_v34 }
 0xe29   :  { %v1691_v45 = vmul.f32 %v1688_v44, %v1667_v43 }
 0xe2b   :  { %1848 = vmatmul.msk.f32.gmra.mxu1 %vm1385_vm2, %v1691_v45 }
 0xe2e   :  { %v2071_v54 = vpop.eup %2070 }
 0xe2f   :  { %v1689_v47 = vadd.f32 1.0, %v2071_v54 }
 0xe31   :  { %v1692_v48 = vmul.f32 %v1689_v47, %v1668_v46 }
 0xe33   :  { %1849 = vmatmul.msk.f32.gmra.mxu1 %vm1385_vm2, %v1692_v48 }
 0xea0   :  { %v1725_v59 = vpop.f32.mrf.mxu1 }
 0xea1   :  { %v1726_v51 = vadd.f32 %v1991_v49, %v1725_v59 }
 0xea3   :  { %v1737_v52 = vadd.f32 %v1734_v50, %v1726_v51 }
 0xea5   :  { %1740 = vst.msk [vmem:[%s2789_s22] sm:$0xff] %vm79_vm0, %v1737_v52 }
 0xea8   :  { %v1728_v53 = vpop.f32.mrf.mxu1 }
 0xea9   :  { %v1729_v0 = vadd.f32 %v1991_v49, %v1728_v53 }
 0xeab   :  { %v1738_v55 = vadd.f32 %v1735_v16, %v1729_v0 }
 0xead   :  { %1741 = vst.msk [vmem:[%s2789_s22 + $0x8] sm:$0xff] %vm79_vm0, %v1738_v55 }
 0xeb0   :  { %v1731_v56 = vpop.f32.mrf.mxu1 }
 0xeb1   :  { %v1732_v57 = vadd.f32 %v1991_v49, %v1731_v56 }
 0xeb3   :  { %v1739_v58 = vadd.f32 %v1736_v63, %v1732_v57 }
 0xeb5   :  { %1742 = vst.msk [vmem:[%s2789_s22 + $0x10] sm:$0x3] %vm86_vm1, %v1739_v58 }

</bundles_post_ra>
